<compile_context>
chip_gen: v7x
topology: tpu7x:2x2x1
jax: 0.10.0
libtpu: 0.0.40
codegen_flags: <defaults>
</compile_context>

<pallas_src>
import functools
import math

import jax
import jax.numpy as jnp
from jax import lax
from jax.experimental import pallas as pl
from jax.experimental.pallas import tpu as pltpu


# Large finite negative used for masking / running-max init.  Finite (instead
# of -inf) so a fully-masked row can never produce (-inf) - (-inf) = NaN in the
# online-softmax rescale (and exp(NEG_INF - finite) flushes cleanly to 0).
NEG_INF = -1e30


def _fused_flash_mha_kernel(
    xq_ref, xkv_ref, wq_ref, wk_ref, wv_ref,      # inputs
    o_ref,                                         # output (1, tq, H*d_out)
    q_scr, m_scr, l_scr, acc_scr,                  # scratch
    *, num_heads, d_out, tq, tkv, scale, mm_dtype,
):
    qi = pl.program_id(1)
    ki = pl.program_id(2)
    nk = pl.num_programs(2)

    q_start = qi * tq
    kv_start = ki * tkv

    @pl.when(ki == 0)
    def _init():
        m_scr[...] = jnp.full_like(m_scr, NEG_INF)
        l_scr[...] = jnp.zeros_like(l_scr)
        acc_scr[...] = jnp.zeros_like(acc_scr)
        # Fused Q projection for this q-tile, reused across the whole kv loop.
        x_q = xq_ref[0]                                              # (tq, d_in)
        q = jnp.dot(x_q, wq_ref[...], preferred_element_type=jnp.float32)
        # Fold 1/sqrt(d_out) into q (tq*H*d_out muls instead of tq*tkv per tile).
        q_scr[...] = (q * scale).astype(q_scr.dtype)

    # Causal skip: this kv tile contributes only if its first key index is <=
    # the last query index of the q tile.  (Saves ~half the MXU/EUP work.)
    @pl.when(kv_start <= q_start + (tq - 1))
    def _compute():
        x_kv = xkv_ref[0]                                            # (tkv, d_in)
        # Fused K/V projections for this kv-tile (lane-dense N = H*d_out).
        k = jnp.dot(x_kv, wk_ref[...],
                    preferred_element_type=jnp.float32).astype(mm_dtype)
        v = jnp.dot(x_kv, wv_ref[...],
                    preferred_element_type=jnp.float32).astype(mm_dtype)
        q_all = q_scr[...]                                           # (tq, H*d_out)

        # Intra-tile causal mask from global offsets (only tq x tkv, not T x T).
        row = q_start + lax.broadcasted_iota(jnp.int32, (tq, tkv), 0)
        col = kv_start + lax.broadcasted_iota(jnp.int32, (tq, tkv), 1)
        causal = col <= row

        for h in range(num_heads):                                   # static unroll
            sl = slice(h * d_out, (h + 1) * d_out)
            q_h = q_all[:, sl]                                       # (tq,  d_out)
            k_h = k[:, sl]                                           # (tkv, d_out)
            v_h = v[:, sl]                                           # (tkv, d_out)

            # Contract the last axes of q and k directly (no explicit k.T).
            s = lax.dot_general(q_h, k_h, (((1,), (1,)), ((), ())),
                                preferred_element_type=jnp.float32)  # (tq, tkv)
            s = jnp.where(causal, s, NEG_INF)

            # Online softmax update (all f32 — VPU/EUP math stays f32 on v5e).
            m_old = m_scr[h]                                         # (tq, 1)
            m_new = jnp.maximum(m_old, jnp.max(s, axis=-1, keepdims=True))
            alpha = jnp.exp(m_old - m_new)                           # (tq, 1)
            p = jnp.exp(s - m_new)                                   # (tq, tkv)

            l_scr[h] = alpha * l_scr[h] + jnp.sum(p, axis=-1, keepdims=True)
            acc_scr[h] = alpha * acc_scr[h] + jnp.dot(
                p.astype(mm_dtype), v_h, preferred_element_type=jnp.float32)
            m_scr[h] = m_new

    @pl.when(ki == nk - 1)
    def _finalize():
        # Normalize each head, concatenate along the lane dim, one lane-dense
        # store of the full (tq, H*d_out) output block.
        outs = []
        for h in range(num_heads):
            l_h = l_scr[h]                                           # (tq, 1)
            inv_l = pl.reciprocal(l_h, approx=True)                  # EUP slot
            inv_l = inv_l * (2.0 - l_h * inv_l)                      # 1 NR step -> f32 accuracy
            outs.append(acc_scr[h] * inv_l)                          # (tq, d_out) f32
        o_ref[0] = jnp.concatenate(outs, axis=-1).astype(o_ref.dtype)


def _pick_tile(T, target):
    """Largest multiple of 8 <= target that divides T (falls back to T)."""
    if T <= target:
        return T
    t = target
    while t >= 8:
        if T % t == 0:
            return t
        t -= 8
    return T


def multihead_attention_wrapper(x, wq, wk, wv, *, tq=None, tkv=None):
    """x: (B, T, d_in); wq/wk/wv: (H, d_in, d_out) -> (B, T, H*d_out).

    Equivalent to torch.cat([CausalAttention_h(x) for h in heads], dim=-1)
    in eval mode (dropout identity).  Output dtype follows x.dtype.
    """
    B, T, d_in = x.shape
    H, _, d_out = wq.shape
    D = H * d_out

    if tq is None:
        tq = _pick_tile(T, 256)
    if tkv is None:
        tkv = _pick_tile(T, 256)
    assert T % tq == 0 and T % tkv == 0, "sequence length must be tileable"
    # TODO(synk): if T ever needs padding to a tile multiple, mask padded query
    # rows in the wrapper (they would otherwise be fully-masked softmax rows).

    # Stack per-head weights into lane-dense fused projections (d_in, H*d_out),
    # columns ordered [head0 | head1 | ...] so the output is already the concat.
    wq_f = jnp.transpose(wq, (1, 0, 2)).reshape(d_in, D).astype(x.dtype)
    wk_f = jnp.transpose(wk, (1, 0, 2)).reshape(d_in, D).astype(x.dtype)
    wv_f = jnp.transpose(wv, (1, 0, 2)).reshape(d_in, D).astype(x.dtype)

    kernel = functools.partial(
        _fused_flash_mha_kernel,
        num_heads=H, d_out=d_out, tq=tq, tkv=tkv,
        scale=1.0 / math.sqrt(d_out), mm_dtype=x.dtype,
    )

    grid = (B, T // tq, T // tkv)

    # VMEM use per step is O(tq*d_in + tkv*d_in + d_in*D + tq*D + tq*tkv):
    # small enough for the default scoped limit on v5e/v6e/v7x at these tiles;
    # re-derive tq/tkv (and vmem_limit_bytes) for very large d_in/D configs.
    return pl.pallas_call(
        kernel,
        out_shape=jax.ShapeDtypeStruct((B, T, D), x.dtype),
        grid_spec=pltpu.PrefetchScalarGridSpec(
            num_scalar_prefetch=0,
            grid=grid,
            in_specs=[
                pl.BlockSpec((1, tq, d_in), lambda b, qi, ki: (b, qi, 0)),   # x (q-tile)
                pl.BlockSpec((1, tkv, d_in), lambda b, qi, ki: (b, ki, 0)),  # x (kv-tile)
                pl.BlockSpec((d_in, D), lambda b, qi, ki: (0, 0)),           # Wq fused
                pl.BlockSpec((d_in, D), lambda b, qi, ki: (0, 0)),           # Wk fused
                pl.BlockSpec((d_in, D), lambda b, qi, ki: (0, 0)),           # Wv fused
            ],
            # Same output block across the kv axis -> VMEM-resident accumulator,
            # written once on the last kv step (lane-dense H*d_out store).
            out_specs=pl.BlockSpec((1, tq, D), lambda b, qi, ki: (b, qi, 0)),
            scratch_shapes=[
                pltpu.VMEM((tq, D), x.dtype),              # q for current q-tile
                pltpu.VMEM((H, tq, 1), jnp.float32),       # running max per head
                pltpu.VMEM((H, tq, 1), jnp.float32),       # running denom per head
                pltpu.VMEM((H, tq, d_out), jnp.float32),   # running context per head
            ],
        ),
        compiler_params=pltpu.CompilerParams(
            dimension_semantics=("parallel", "parallel", "arbitrary"),
        ),
    )(x, x, wq_f, wk_f, wv_f)


def _reference(x, wq, wk, wv):
    """Pure-JAX f32 reference of the same math (eval-mode causal MHA concat)."""
    xf = x.astype(jnp.float32)
    H, _, d_out = wq.shape
    T = x.shape[1]
    mask = jnp.tril(jnp.ones((T, T), dtype=bool))
    outs = []
    for h in range(H):
        q = jnp.einsum('btd,de->bte', xf, wq[h].astype(jnp.float32), precision='highest')
        k = jnp.einsum('btd,de->bte', xf, wk[h].astype(jnp.float32), precision='highest')
        v = jnp.einsum('btd,de->bte', xf, wv[h].astype(jnp.float32), precision='highest')
        s = jnp.einsum('bqe,bke->bqk', q, k, precision='highest') / math.sqrt(d_out)
        s = jnp.where(mask[None], s, -jnp.inf)
        a = jax.nn.softmax(s, axis=-1)
        outs.append(jnp.einsum('bqk,bke->bqe', a, v, precision='highest'))
    return jnp.concatenate(outs, axis=-1)


if __name__ == "__main__":
    # Small shapes consistent with the module; H*d_out = 128 keeps the fused
    # output lane-dense, and T=128 with 32-wide tiles exercises the flash
    # accumulation + causal tile skipping paths (grid = (2, 4, 4)).
    B, T = 2, 128
    d_in, d_out, num_heads = 64, 32, 4
    context_length = T   # causal mask covers the full sequence
    dropout = 0.0        # eval-mode / zero dropout

    key = jax.random.PRNGKey(0)
    kx, kq, kk, kv = jax.random.split(key, 4)

    x = jax.random.normal(kx, (B, T, d_in), dtype=jnp.float32)
    # Deterministic per-head projection weights (qkv_bias=False)
    wq = jax.random.normal(kq, (num_heads, d_in, d_out), dtype=jnp.float32) * 0.05
    wk = jax.random.normal(kk, (num_heads, d_in, d_out), dtype=jnp.float32) * 0.05
    wv = jax.random.normal(kv, (num_heads, d_in, d_out), dtype=jnp.float32) * 0.05

    # float32 path
    out = multihead_attention_wrapper(x, wq, wk, wv, tq=32, tkv=32)
    out = jax.block_until_ready(out)
    ref = _reference(x, wq, wk, wv)
    assert out.shape == (B, T, num_heads * d_out)
    assert jnp.allclose(out, ref, atol=2e-3, rtol=2e-3)

    # bf16 path (bf16 MXU operands, f32 softmax/accumulation inside the kernel)
    xb = x.astype(jnp.bfloat16)
    wqb, wkb, wvb = (w.astype(jnp.bfloat16) for w in (wq, wk, wv))
    out_bf = multihead_attention_wrapper(xb, wqb, wkb, wvb, tq=32, tkv=32)
    out_bf = jax.block_until_ready(out_bf)
    ref_bf = _reference(xb, wqb, wkb, wvb)
    assert out_bf.dtype == jnp.bfloat16
    assert jnp.allclose(out_bf.astype(jnp.float32), ref_bf, atol=5e-2, rtol=5e-2)

    print("KERNEL_OK")
</pallas_src>

<mosaic_0001>
module attributes {stable_mosaic.version = 11 : i64} {
  func.func @_fused_flash_mha_kernel(%arg0: i32, %arg1: i32, %arg2: i32, %arg3: memref<1x32x64xf32, #tpu.memory_space<vmem>>, %arg4: memref<1x32x64xf32, #tpu.memory_space<vmem>>, %arg5: memref<64x128xf32, #tpu.memory_space<vmem>>, %arg6: memref<64x128xf32, #tpu.memory_space<vmem>>, %arg7: memref<64x128xf32, #tpu.memory_space<vmem>>, %arg8: memref<1x32x128xf32, #tpu.memory_space<vmem>>, %arg9: memref<32x128xf32, #tpu.memory_space<vmem>>, %arg10: memref<4x32x1xf32, #tpu.memory_space<vmem>>, %arg11: memref<4x32x1xf32, #tpu.memory_space<vmem>>, %arg12: memref<4x32x32xf32, #tpu.memory_space<vmem>>) attributes {dimension_semantics = [#tpu.dimension_semantics<parallel>, #tpu.dimension_semantics<parallel>, #tpu.dimension_semantics<arbitrary>], iteration_bounds = array<i64: 2, 4, 4>, scalar_prefetch = 0 : i64, scratch_operands = 4 : i64, tpu.core_type = #tpu.core_type<tc>, window_params = [{transform_indices = @transform_0, window_bounds = array<i64: 1, 32, 64>}, {transform_indices = @transform_1, window_bounds = array<i64: 1, 32, 64>}, {pipeline_mode = #tpu.pipeline_mode<synchronous>, transform_indices = @transform_2, window_bounds = array<i64: 64, 128>}, {pipeline_mode = #tpu.pipeline_mode<synchronous>, transform_indices = @transform_3, window_bounds = array<i64: 64, 128>}, {pipeline_mode = #tpu.pipeline_mode<synchronous>, transform_indices = @transform_4, window_bounds = array<i64: 64, 128>}, {transform_indices = @transform_5, window_bounds = array<i64: 1, 32, 128>}]} {
    %c32_i32 = arith.constant 32 : i32
    %0 = arith.muli %arg1, %c32_i32 : i32
    %c32_i32_0 = arith.constant 32 : i32
    %1 = arith.muli %arg2, %c32_i32_0 : i32
    %c0_i32 = arith.constant 0 : i32
    %2 = arith.cmpi eq, %arg2, %c0_i32 : i32
    %3 = arith.extui %2 : i1 to i32
    %c0_i32_1 = arith.constant 0 : i32
    %4 = arith.cmpi ne, %3, %c0_i32_1 : i32
    scf.if %4 {
      %cst = arith.constant -1.000000e+30 : f32
      %12 = vector.broadcast %cst : f32 to vector<4x32x1xf32>
      %c0 = arith.constant 0 : index
      %c0_4 = arith.constant 0 : index
      %c0_5 = arith.constant 0 : index
      %13 = vector.load %arg10[%c0, %c0_4, %c0_5] : memref<4x32x1xf32, #tpu.memory_space<vmem>>, vector<4x32x1xf32>
      tpu.vector_store %arg10[%c0, %c0_4, %c0_5], %12 {strides = array<i32>} : memref<4x32x1xf32, #tpu.memory_space<vmem>>, vector<4x32x1xf32>,
      %cst_6 = arith.constant 0.000000e+00 : f32
      %14 = vector.broadcast %cst_6 : f32 to vector<4x32x1xf32>
      %c0_7 = arith.constant 0 : index
      %c0_8 = arith.constant 0 : index
      %c0_9 = arith.constant 0 : index
      %15 = vector.load %arg11[%c0_7, %c0_8, %c0_9] : memref<4x32x1xf32, #tpu.memory_space<vmem>>, vector<4x32x1xf32>
      tpu.vector_store %arg11[%c0_7, %c0_8, %c0_9], %14 {strides = array<i32>} : memref<4x32x1xf32, #tpu.memory_space<vmem>>, vector<4x32x1xf32>,
      %cst_10 = arith.constant 0.000000e+00 : f32
      %16 = vector.broadcast %cst_10 : f32 to vector<4x32x32xf32>
      %c0_11 = arith.constant 0 : index
      %c0_12 = arith.constant 0 : index
      %c0_13 = arith.constant 0 : index
      %17 = vector.load %arg12[%c0_11, %c0_12, %c0_13] : memref<4x32x32xf32, #tpu.memory_space<vmem>>, vector<4x32x32xf32>
      tpu.vector_store %arg12[%c0_11, %c0_12, %c0_13], %16 {strides = array<i32>} : memref<4x32x32xf32, #tpu.memory_space<vmem>>, vector<4x32x32xf32>,
      %c0_14 = arith.constant 0 : index
      %c0_15 = arith.constant 0 : index
      %c0_16 = arith.constant 0 : index
      %18 = vector.load %arg3[%c0_14, %c0_15, %c0_16] : memref<1x32x64xf32, #tpu.memory_space<vmem>>, vector<1x32x64xf32>
      %19 = vector.shape_cast %18 : vector<1x32x64xf32> to vector<32x64xf32>
      %c0_17 = arith.constant 0 : index
      %c0_18 = arith.constant 0 : index
      %20 = vector.load %arg5[%c0_17, %c0_18] : memref<64x128xf32, #tpu.memory_space<vmem>>, vector<64x128xf32>
      %cst_19 = arith.constant dense<0.000000e+00> : vector<32x128xf32>
      %21 = tpu.matmul %19, %20, %cst_19 {dimension_numbers = #tpu.dot_dimension_numbers<[1], [0], [0], [1], [0, 0, 1, 1], [], []>} : vector<32x64xf32>, vector<64x128xf32>, vector<32x128xf32> -> vector<32x128xf32>
      %cst_20 = arith.constant 0.176776692 : f32
      %22 = vector.broadcast %cst_20 : f32 to vector<32x128xf32>
      %23 = arith.mulf %21, %22 : vector<32x128xf32>
      %c0_21 = arith.constant 0 : index
      %c0_22 = arith.constant 0 : index
      %24 = vector.load %arg9[%c0_21, %c0_22] : memref<32x128xf32, #tpu.memory_space<vmem>>, vector<32x128xf32>
      tpu.vector_store %arg9[%c0_21, %c0_22], %23 {strides = array<i32>} : memref<32x128xf32, #tpu.memory_space<vmem>>, vector<32x128xf32>,
    } else {
    }
    %c31_i32 = arith.constant 31 : i32
    %5 = arith.addi %0, %c31_i32 : i32
    %6 = arith.cmpi sle, %1, %5 : i32
    %7 = arith.extui %6 : i1 to i32
    %c0_i32_2 = arith.constant 0 : i32
    %8 = arith.cmpi ne, %7, %c0_i32_2 : i32
    scf.if %8 {
      %c0 = arith.constant 0 : index
      %c0_4 = arith.constant 0 : index
      %c0_5 = arith.constant 0 : index
      %12 = vector.load %arg4[%c0, %c0_4, %c0_5] : memref<1x32x64xf32, #tpu.memory_space<vmem>>, vector<1x32x64xf32>
      %13 = vector.shape_cast %12 : vector<1x32x64xf32> to vector<32x64xf32>
      %c0_6 = arith.constant 0 : index
      %c0_7 = arith.constant 0 : index
      %14 = vector.load %arg6[%c0_6, %c0_7] : memref<64x128xf32, #tpu.memory_space<vmem>>, vector<64x128xf32>
      %cst = arith.constant dense<0.000000e+00> : vector<32x128xf32>
      %15 = tpu.matmul %13, %14, %cst {dimension_numbers = #tpu.dot_dimension_numbers<[1], [0], [0], [1], [0, 0, 1, 1], [], []>} : vector<32x64xf32>, vector<64x128xf32>, vector<32x128xf32> -> vector<32x128xf32>
      %c0_8 = arith.constant 0 : index
      %c0_9 = arith.constant 0 : index
      %16 = vector.load %arg7[%c0_8, %c0_9] : memref<64x128xf32, #tpu.memory_space<vmem>>, vector<64x128xf32>
      %cst_10 = arith.constant dense<0.000000e+00> : vector<32x128xf32>
      %17 = tpu.matmul %13, %16, %cst_10 {dimension_numbers = #tpu.dot_dimension_numbers<[1], [0], [0], [1], [0, 0, 1, 1], [], []>} : vector<32x64xf32>, vector<64x128xf32>, vector<32x128xf32> -> vector<32x128xf32>
      %c0_11 = arith.constant 0 : index
      %c0_12 = arith.constant 0 : index
      %18 = vector.load %arg9[%c0_11, %c0_12] : memref<32x128xf32, #tpu.memory_space<vmem>>, vector<32x128xf32>
      %19 = tpu.iota {dimensions = array<i32: 0>} : vector<32x32xi32>
      %20 = vector.broadcast %0 : i32 to vector<32x32xi32>
      %21 = arith.addi %20, %19 : vector<32x32xi32>
      %22 = tpu.iota {dimensions = array<i32: 1>} : vector<32x32xi32>
      %23 = vector.broadcast %1 : i32 to vector<32x32xi32>
      %24 = arith.addi %23, %22 : vector<32x32xi32>
      %25 = arith.cmpi sle, %24, %21 : vector<32x32xi32>
      %26 = vector.extract_strided_slice %18 {offsets = [0, 0], sizes = [32, 32], strides = [1, 1]} : vector<32x128xf32> to vector<32x32xf32>
      %27 = vector.extract_strided_slice %15 {offsets = [0, 0], sizes = [32, 32], strides = [1, 1]} : vector<32x128xf32> to vector<32x32xf32>
      %28 = vector.extract_strided_slice %17 {offsets = [0, 0], sizes = [32, 32], strides = [1, 1]} : vector<32x128xf32> to vector<32x32xf32>
      %cst_13 = arith.constant dense<0.000000e+00> : vector<32x32xf32>
      %29 = tpu.matmul %26, %27, %cst_13 {dimension_numbers = #tpu.dot_dimension_numbers<[1], [1], [0], [0], [0, 0, 1, 0], [], []>} : vector<32x32xf32>, vector<32x32xf32>, vector<32x32xf32> -> vector<32x32xf32>
      %cst_14 = arith.constant -1.000000e+30 : f32
      %30 = vector.broadcast %cst_14 : f32 to vector<32x32xf32>
      %31 = arith.select %25, %29, %30 : vector<32x32xi1>, vector<32x32xf32>
      %c0_15 = arith.constant 0 : index
      %c0_16 = arith.constant 0 : index
      %c0_17 = arith.constant 0 : index
      %32 = vector.load %arg10[%c0_15, %c0_16, %c0_17] : memref<4x32x1xf32, #tpu.memory_space<vmem>>, vector<1x32x1xf32>
      %33 = vector.shape_cast %32 : vector<1x32x1xf32> to vector<32x1xf32>
      %cst_18 = arith.constant dense<0xFF800000> : vector<32xf32>
      %34 = vector.multi_reduction <maximumf>, %31, %cst_18 [1] : vector<32x32xf32> to vector<32xf32>
      %35 = vector.shape_cast %34 : vector<32xf32> to vector<32x1xf32>
      %36 = arith.maximumf %33, %35 : vector<32x1xf32>
      %37 = arith.subf %33, %36 : vector<32x1xf32>
      %38 = math.exp %37 : vector<32x1xf32>
      %39 = vector.broadcast %36 : vector<32x1xf32> to vector<32x32xf32>
      %40 = arith.subf %31, %39 : vector<32x32xf32>
      %41 = math.exp %40 : vector<32x32xf32>
      %c0_19 = arith.constant 0 : index
      %c0_20 = arith.constant 0 : index
      %c0_21 = arith.constant 0 : index
      %42 = vector.load %arg11[%c0_19, %c0_20, %c0_21] : memref<4x32x1xf32, #tpu.memory_space<vmem>>, vector<1x32x1xf32>
      %43 = vector.shape_cast %42 : vector<1x32x1xf32> to vector<32x1xf32>
      %44 = arith.mulf %38, %43 : vector<32x1xf32>
      %cst_22 = arith.constant dense<0.000000e+00> : vector<32xf32>
      %45 = vector.multi_reduction <add>, %41, %cst_22 [1] : vector<32x32xf32> to vector<32xf32>
      %46 = vector.shape_cast %45 : vector<32xf32> to vector<32x1xf32>
      %47 = arith.addf %44, %46 : vector<32x1xf32>
      %c0_23 = arith.constant 0 : index
      %c0_24 = arith.constant 0 : index
      %c0_25 = arith.constant 0 : index
      %48 = vector.load %arg11[%c0_23, %c0_24, %c0_25] : memref<4x32x1xf32, #tpu.memory_space<vmem>>, vector<1x32x1xf32>
      %49 = vector.shape_cast %48 : vector<1x32x1xf32> to vector<32x1xf32>
      %50 = vector.shape_cast %47 : vector<32x1xf32> to vector<1x32x1xf32>
      tpu.vector_store %arg11[%c0_23, %c0_24, %c0_25], %50 {strides = array<i32>} : memref<4x32x1xf32, #tpu.memory_space<vmem>>, vector<1x32x1xf32>,
      %c0_26 = arith.constant 0 : index
      %c0_27 = arith.constant 0 : index
      %c0_28 = arith.constant 0 : index
      %51 = vector.load %arg12[%c0_26, %c0_27, %c0_28] : memref<4x32x32xf32, #tpu.memory_space<vmem>>, vector<1x32x32xf32>
      %52 = vector.shape_cast %51 : vector<1x32x32xf32> to vector<32x32xf32>
      %53 = vector.broadcast %38 : vector<32x1xf32> to vector<32x32xf32>
      %54 = arith.mulf %53, %52 : vector<32x32xf32>
      %cst_29 = arith.constant dense<0.000000e+00> : vector<32x32xf32>
      %55 = tpu.matmul %41, %28, %cst_29 {dimension_numbers = #tpu.dot_dimension_numbers<[1], [0], [0], [1], [0, 0, 1, 1], [], []>} : vector<32x32xf32>, vector<32x32xf32>, vector<32x32xf32> -> vector<32x32xf32>
      %56 = arith.addf %54, %55 : vector<32x32xf32>
      %c0_30 = arith.constant 0 : index
      %c0_31 = arith.constant 0 : index
      %c0_32 = arith.constant 0 : index
      %57 = vector.load %arg12[%c0_30, %c0_31, %c0_32] : memref<4x32x32xf32, #tpu.memory_space<vmem>>, vector<1x32x32xf32>
      %58 = vector.shape_cast %57 : vector<1x32x32xf32> to vector<32x32xf32>
      %59 = vector.shape_cast %56 : vector<32x32xf32> to vector<1x32x32xf32>
      tpu.vector_store %arg12[%c0_30, %c0_31, %c0_32], %59 {strides = array<i32>} : memref<4x32x32xf32, #tpu.memory_space<vmem>>, vector<1x32x32xf32>,
      %c0_33 = arith.constant 0 : index
      %c0_34 = arith.constant 0 : index
      %c0_35 = arith.constant 0 : index
      %60 = vector.load %arg10[%c0_33, %c0_34, %c0_35] : memref<4x32x1xf32, #tpu.memory_space<vmem>>, vector<1x32x1xf32>
      %61 = vector.shape_cast %60 : vector<1x32x1xf32> to vector<32x1xf32>
      %62 = vector.shape_cast %36 : vector<32x1xf32> to vector<1x32x1xf32>
      tpu.vector_store %arg10[%c0_33, %c0_34, %c0_35], %62 {strides = array<i32>} : memref<4x32x1xf32, #tpu.memory_space<vmem>>, vector<1x32x1xf32>,
      %63 = vector.extract_strided_slice %18 {offsets = [0, 32], sizes = [32, 32], strides = [1, 1]} : vector<32x128xf32> to vector<32x32xf32>
      %64 = vector.extract_strided_slice %15 {offsets = [0, 32], sizes = [32, 32], strides = [1, 1]} : vector<32x128xf32> to vector<32x32xf32>
      %65 = vector.extract_strided_slice %17 {offsets = [0, 32], sizes = [32, 32], strides = [1, 1]} : vector<32x128xf32> to vector<32x32xf32>
      %cst_36 = arith.constant dense<0.000000e+00> : vector<32x32xf32>
      %66 = tpu.matmul %63, %64, %cst_36 {dimension_numbers = #tpu.dot_dimension_numbers<[1], [1], [0], [0], [0, 0, 1, 0], [], []>} : vector<32x32xf32>, vector<32x32xf32>, vector<32x32xf32> -> vector<32x32xf32>
      %cst_37 = arith.constant -1.000000e+30 : f32
      %67 = vector.broadcast %cst_37 : f32 to vector<32x32xf32>
      %68 = arith.select %25, %66, %67 : vector<32x32xi1>, vector<32x32xf32>
      %c1 = arith.constant 1 : index
      %c0_38 = arith.constant 0 : index
      %c0_39 = arith.constant 0 : index
      %69 = vector.load %arg10[%c1, %c0_38, %c0_39] : memref<4x32x1xf32, #tpu.memory_space<vmem>>, vector<1x32x1xf32>
      %70 = vector.shape_cast %69 : vector<1x32x1xf32> to vector<32x1xf32>
      %cst_40 = arith.constant dense<0xFF800000> : vector<32xf32>
      %71 = vector.multi_reduction <maximumf>, %68, %cst_40 [1] : vector<32x32xf32> to vector<32xf32>
      %72 = vector.shape_cast %71 : vector<32xf32> to vector<32x1xf32>
      %73 = arith.maximumf %70, %72 : vector<32x1xf32>
      %74 = arith.subf %70, %73 : vector<32x1xf32>
      %75 = math.exp %74 : vector<32x1xf32>
      %76 = vector.broadcast %73 : vector<32x1xf32> to vector<32x32xf32>
      %77 = arith.subf %68, %76 : vector<32x32xf32>
      %78 = math.exp %77 : vector<32x32xf32>
      %c1_41 = arith.constant 1 : index
      %c0_42 = arith.constant 0 : index
      %c0_43 = arith.constant 0 : index
      %79 = vector.load %arg11[%c1_41, %c0_42, %c0_43] : memref<4x32x1xf32, #tpu.memory_space<vmem>>, vector<1x32x1xf32>
      %80 = vector.shape_cast %79 : vector<1x32x1xf32> to vector<32x1xf32>
      %81 = arith.mulf %75, %80 : vector<32x1xf32>
      %cst_44 = arith.constant dense<0.000000e+00> : vector<32xf32>
      %82 = vector.multi_reduction <add>, %78, %cst_44 [1] : vector<32x32xf32> to vector<32xf32>
      %83 = vector.shape_cast %82 : vector<32xf32> to vector<32x1xf32>
      %84 = arith.addf %81, %83 : vector<32x1xf32>
      %c1_45 = arith.constant 1 : index
      %c0_46 = arith.constant 0 : index
      %c0_47 = arith.constant 0 : index
      %85 = vector.load %arg11[%c1_45, %c0_46, %c0_47] : memref<4x32x1xf32, #tpu.memory_space<vmem>>, vector<1x32x1xf32>
      %86 = vector.shape_cast %85 : vector<1x32x1xf32> to vector<32x1xf32>
      %87 = vector.shape_cast %84 : vector<32x1xf32> to vector<1x32x1xf32>
      tpu.vector_store %arg11[%c1_45, %c0_46, %c0_47], %87 {strides = array<i32>} : memref<4x32x1xf32, #tpu.memory_space<vmem>>, vector<1x32x1xf32>,
      %c1_48 = arith.constant 1 : index
      %c0_49 = arith.constant 0 : index
      %c0_50 = arith.constant 0 : index
      %88 = vector.load %arg12[%c1_48, %c0_49, %c0_50] : memref<4x32x32xf32, #tpu.memory_space<vmem>>, vector<1x32x32xf32>
      %89 = vector.shape_cast %88 : vector<1x32x32xf32> to vector<32x32xf32>
      %90 = vector.broadcast %75 : vector<32x1xf32> to vector<32x32xf32>
      %91 = arith.mulf %90, %89 : vector<32x32xf32>
      %cst_51 = arith.constant dense<0.000000e+00> : vector<32x32xf32>
      %92 = tpu.matmul %78, %65, %cst_51 {dimension_numbers = #tpu.dot_dimension_numbers<[1], [0], [0], [1], [0, 0, 1, 1], [], []>} : vector<32x32xf32>, vector<32x32xf32>, vector<32x32xf32> -> vector<32x32xf32>
      %93 = arith.addf %91, %92 : vector<32x32xf32>
      %c1_52 = arith.constant 1 : index
      %c0_53 = arith.constant 0 : index
      %c0_54 = arith.constant 0 : index
      %94 = vector.load %arg12[%c1_52, %c0_53, %c0_54] : memref<4x32x32xf32, #tpu.memory_space<vmem>>, vector<1x32x32xf32>
      %95 = vector.shape_cast %94 : vector<1x32x32xf32> to vector<32x32xf32>
      %96 = vector.shape_cast %93 : vector<32x32xf32> to vector<1x32x32xf32>
      tpu.vector_store %arg12[%c1_52, %c0_53, %c0_54], %96 {strides = array<i32>} : memref<4x32x32xf32, #tpu.memory_space<vmem>>, vector<1x32x32xf32>,
      %c1_55 = arith.constant 1 : index
      %c0_56 = arith.constant 0 : index
      %c0_57 = arith.constant 0 : index
      %97 = vector.load %arg10[%c1_55, %c0_56, %c0_57] : memref<4x32x1xf32, #tpu.memory_space<vmem>>, vector<1x32x1xf32>
      %98 = vector.shape_cast %97 : vector<1x32x1xf32> to vector<32x1xf32>
      %99 = vector.shape_cast %73 : vector<32x1xf32> to vector<1x32x1xf32>
      tpu.vector_store %arg10[%c1_55, %c0_56, %c0_57], %99 {strides = array<i32>} : memref<4x32x1xf32, #tpu.memory_space<vmem>>, vector<1x32x1xf32>,
      %100 = vector.extract_strided_slice %18 {offsets = [0, 64], sizes = [32, 32], strides = [1, 1]} : vector<32x128xf32> to vector<32x32xf32>
      %101 = vector.extract_strided_slice %15 {offsets = [0, 64], sizes = [32, 32], strides = [1, 1]} : vector<32x128xf32> to vector<32x32xf32>
      %102 = vector.extract_strided_slice %17 {offsets = [0, 64], sizes = [32, 32], strides = [1, 1]} : vector<32x128xf32> to vector<32x32xf32>
      %cst_58 = arith.constant dense<0.000000e+00> : vector<32x32xf32>
      %103 = tpu.matmul %100, %101, %cst_58 {dimension_numbers = #tpu.dot_dimension_numbers<[1], [1], [0], [0], [0, 0, 1, 0], [], []>} : vector<32x32xf32>, vector<32x32xf32>, vector<32x32xf32> -> vector<32x32xf32>
      %cst_59 = arith.constant -1.000000e+30 : f32
      %104 = vector.broadcast %cst_59 : f32 to vector<32x32xf32>
      %105 = arith.select %25, %103, %104 : vector<32x32xi1>, vector<32x32xf32>
      %c2 = arith.constant 2 : index
      %c0_60 = arith.constant 0 : index
      %c0_61 = arith.constant 0 : index
      %106 = vector.load %arg10[%c2, %c0_60, %c0_61] : memref<4x32x1xf32, #tpu.memory_space<vmem>>, vector<1x32x1xf32>
      %107 = vector.shape_cast %106 : vector<1x32x1xf32> to vector<32x1xf32>
      %cst_62 = arith.constant dense<0xFF800000> : vector<32xf32>
      %108 = vector.multi_reduction <maximumf>, %105, %cst_62 [1] : vector<32x32xf32> to vector<32xf32>
      %109 = vector.shape_cast %108 : vector<32xf32> to vector<32x1xf32>
      %110 = arith.maximumf %107, %109 : vector<32x1xf32>
      %111 = arith.subf %107, %110 : vector<32x1xf32>
      %112 = math.exp %111 : vector<32x1xf32>
      %113 = vector.broadcast %110 : vector<32x1xf32> to vector<32x32xf32>
      %114 = arith.subf %105, %113 : vector<32x32xf32>
      %115 = math.exp %114 : vector<32x32xf32>
      %c2_63 = arith.constant 2 : index
      %c0_64 = arith.constant 0 : index
      %c0_65 = arith.constant 0 : index
      %116 = vector.load %arg11[%c2_63, %c0_64, %c0_65] : memref<4x32x1xf32, #tpu.memory_space<vmem>>, vector<1x32x1xf32>
      %117 = vector.shape_cast %116 : vector<1x32x1xf32> to vector<32x1xf32>
      %118 = arith.mulf %112, %117 : vector<32x1xf32>
      %cst_66 = arith.constant dense<0.000000e+00> : vector<32xf32>
      %119 = vector.multi_reduction <add>, %115, %cst_66 [1] : vector<32x32xf32> to vector<32xf32>
      %120 = vector.shape_cast %119 : vector<32xf32> to vector<32x1xf32>
      %121 = arith.addf %118, %120 : vector<32x1xf32>
      %c2_67 = arith.constant 2 : index
      %c0_68 = arith.constant 0 : index
      %c0_69 = arith.constant 0 : index
      %122 = vector.load %arg11[%c2_67, %c0_68, %c0_69] : memref<4x32x1xf32, #tpu.memory_space<vmem>>, vector<1x32x1xf32>
      %123 = vector.shape_cast %122 : vector<1x32x1xf32> to vector<32x1xf32>
      %124 = vector.shape_cast %121 : vector<32x1xf32> to vector<1x32x1xf32>
      tpu.vector_store %arg11[%c2_67, %c0_68, %c0_69], %124 {strides = array<i32>} : memref<4x32x1xf32, #tpu.memory_space<vmem>>, vector<1x32x1xf32>,
      %c2_70 = arith.constant 2 : index
      %c0_71 = arith.constant 0 : index
      %c0_72 = arith.constant 0 : index
      %125 = vector.load %arg12[%c2_70, %c0_71, %c0_72] : memref<4x32x32xf32, #tpu.memory_space<vmem>>, vector<1x32x32xf32>
      %126 = vector.shape_cast %125 : vector<1x32x32xf32> to vector<32x32xf32>
      %127 = vector.broadcast %112 : vector<32x1xf32> to vector<32x32xf32>
      %128 = arith.mulf %127, %126 : vector<32x32xf32>
      %cst_73 = arith.constant dense<0.000000e+00> : vector<32x32xf32>
      %129 = tpu.matmul %115, %102, %cst_73 {dimension_numbers = #tpu.dot_dimension_numbers<[1], [0], [0], [1], [0, 0, 1, 1], [], []>} : vector<32x32xf32>, vector<32x32xf32>, vector<32x32xf32> -> vector<32x32xf32>
      %130 = arith.addf %128, %129 : vector<32x32xf32>
      %c2_74 = arith.constant 2 : index
      %c0_75 = arith.constant 0 : index
      %c0_76 = arith.constant 0 : index
      %131 = vector.load %arg12[%c2_74, %c0_75, %c0_76] : memref<4x32x32xf32, #tpu.memory_space<vmem>>, vector<1x32x32xf32>
      %132 = vector.shape_cast %131 : vector<1x32x32xf32> to vector<32x32xf32>
      %133 = vector.shape_cast %130 : vector<32x32xf32> to vector<1x32x32xf32>
      tpu.vector_store %arg12[%c2_74, %c0_75, %c0_76], %133 {strides = array<i32>} : memref<4x32x32xf32, #tpu.memory_space<vmem>>, vector<1x32x32xf32>,
      %c2_77 = arith.constant 2 : index
      %c0_78 = arith.constant 0 : index
      %c0_79 = arith.constant 0 : index
      %134 = vector.load %arg10[%c2_77, %c0_78, %c0_79] : memref<4x32x1xf32, #tpu.memory_space<vmem>>, vector<1x32x1xf32>
      %135 = vector.shape_cast %134 : vector<1x32x1xf32> to vector<32x1xf32>
      %136 = vector.shape_cast %110 : vector<32x1xf32> to vector<1x32x1xf32>
      tpu.vector_store %arg10[%c2_77, %c0_78, %c0_79], %136 {strides = array<i32>} : memref<4x32x1xf32, #tpu.memory_space<vmem>>, vector<1x32x1xf32>,
      %137 = vector.extract_strided_slice %18 {offsets = [0, 96], sizes = [32, 32], strides = [1, 1]} : vector<32x128xf32> to vector<32x32xf32>
      %138 = vector.extract_strided_slice %15 {offsets = [0, 96], sizes = [32, 32], strides = [1, 1]} : vector<32x128xf32> to vector<32x32xf32>
      %139 = vector.extract_strided_slice %17 {offsets = [0, 96], sizes = [32, 32], strides = [1, 1]} : vector<32x128xf32> to vector<32x32xf32>
      %cst_80 = arith.constant dense<0.000000e+00> : vector<32x32xf32>
      %140 = tpu.matmul %137, %138, %cst_80 {dimension_numbers = #tpu.dot_dimension_numbers<[1], [1], [0], [0], [0, 0, 1, 0], [], []>} : vector<32x32xf32>, vector<32x32xf32>, vector<32x32xf32> -> vector<32x32xf32>
      %cst_81 = arith.constant -1.000000e+30 : f32
      %141 = vector.broadcast %cst_81 : f32 to vector<32x32xf32>
      %142 = arith.select %25, %140, %141 : vector<32x32xi1>, vector<32x32xf32>
      %c3 = arith.constant 3 : index
      %c0_82 = arith.constant 0 : index
      %c0_83 = arith.constant 0 : index
      %143 = vector.load %arg10[%c3, %c0_82, %c0_83] : memref<4x32x1xf32, #tpu.memory_space<vmem>>, vector<1x32x1xf32>
      %144 = vector.shape_cast %143 : vector<1x32x1xf32> to vector<32x1xf32>
      %cst_84 = arith.constant dense<0xFF800000> : vector<32xf32>
      %145 = vector.multi_reduction <maximumf>, %142, %cst_84 [1] : vector<32x32xf32> to vector<32xf32>
      %146 = vector.shape_cast %145 : vector<32xf32> to vector<32x1xf32>
      %147 = arith.maximumf %144, %146 : vector<32x1xf32>
      %148 = arith.subf %144, %147 : vector<32x1xf32>
      %149 = math.exp %148 : vector<32x1xf32>
      %150 = vector.broadcast %147 : vector<32x1xf32> to vector<32x32xf32>
      %151 = arith.subf %142, %150 : vector<32x32xf32>
      %152 = math.exp %151 : vector<32x32xf32>
      %c3_85 = arith.constant 3 : index
      %c0_86 = arith.constant 0 : index
      %c0_87 = arith.constant 0 : index
      %153 = vector.load %arg11[%c3_85, %c0_86, %c0_87] : memref<4x32x1xf32, #tpu.memory_space<vmem>>, vector<1x32x1xf32>
      %154 = vector.shape_cast %153 : vector<1x32x1xf32> to vector<32x1xf32>
      %155 = arith.mulf %149, %154 : vector<32x1xf32>
      %cst_88 = arith.constant dense<0.000000e+00> : vector<32xf32>
      %156 = vector.multi_reduction <add>, %152, %cst_88 [1] : vector<32x32xf32> to vector<32xf32>
      %157 = vector.shape_cast %156 : vector<32xf32> to vector<32x1xf32>
      %158 = arith.addf %155, %157 : vector<32x1xf32>
      %c3_89 = arith.constant 3 : index
      %c0_90 = arith.constant 0 : index
      %c0_91 = arith.constant 0 : index
      %159 = vector.load %arg11[%c3_89, %c0_90, %c0_91] : memref<4x32x1xf32, #tpu.memory_space<vmem>>, vector<1x32x1xf32>
      %160 = vector.shape_cast %159 : vector<1x32x1xf32> to vector<32x1xf32>
      %161 = vector.shape_cast %158 : vector<32x1xf32> to vector<1x32x1xf32>
      tpu.vector_store %arg11[%c3_89, %c0_90, %c0_91], %161 {strides = array<i32>} : memref<4x32x1xf32, #tpu.memory_space<vmem>>, vector<1x32x1xf32>,
      %c3_92 = arith.constant 3 : index
      %c0_93 = arith.constant 0 : index
      %c0_94 = arith.constant 0 : index
      %162 = vector.load %arg12[%c3_92, %c0_93, %c0_94] : memref<4x32x32xf32, #tpu.memory_space<vmem>>, vector<1x32x32xf32>
      %163 = vector.shape_cast %162 : vector<1x32x32xf32> to vector<32x32xf32>
      %164 = vector.broadcast %149 : vector<32x1xf32> to vector<32x32xf32>
      %165 = arith.mulf %164, %163 : vector<32x32xf32>
      %cst_95 = arith.constant dense<0.000000e+00> : vector<32x32xf32>
      %166 = tpu.matmul %152, %139, %cst_95 {dimension_numbers = #tpu.dot_dimension_numbers<[1], [0], [0], [1], [0, 0, 1, 1], [], []>} : vector<32x32xf32>, vector<32x32xf32>, vector<32x32xf32> -> vector<32x32xf32>
      %167 = arith.addf %165, %166 : vector<32x32xf32>
      %c3_96 = arith.constant 3 : index
      %c0_97 = arith.constant 0 : index
      %c0_98 = arith.constant 0 : index
      %168 = vector.load %arg12[%c3_96, %c0_97, %c0_98] : memref<4x32x32xf32, #tpu.memory_space<vmem>>, vector<1x32x32xf32>
      %169 = vector.shape_cast %168 : vector<1x32x32xf32> to vector<32x32xf32>
      %170 = vector.shape_cast %167 : vector<32x32xf32> to vector<1x32x32xf32>
      tpu.vector_store %arg12[%c3_96, %c0_97, %c0_98], %170 {strides = array<i32>} : memref<4x32x32xf32, #tpu.memory_space<vmem>>, vector<1x32x32xf32>,
      %c3_99 = arith.constant 3 : index
      %c0_100 = arith.constant 0 : index
      %c0_101 = arith.constant 0 : index
      %171 = vector.load %arg10[%c3_99, %c0_100, %c0_101] : memref<4x32x1xf32, #tpu.memory_space<vmem>>, vector<1x32x1xf32>
      %172 = vector.shape_cast %171 : vector<1x32x1xf32> to vector<32x1xf32>
      %173 = vector.shape_cast %147 : vector<32x1xf32> to vector<1x32x1xf32>
      tpu.vector_store %arg10[%c3_99, %c0_100, %c0_101], %173 {strides = array<i32>} : memref<4x32x1xf32, #tpu.memory_space<vmem>>, vector<1x32x1xf32>,
    } else {
    }
    %c3_i32 = arith.constant 3 : i32
    %9 = arith.cmpi eq, %arg2, %c3_i32 : i32
    %10 = arith.extui %9 : i1 to i32
    %c0_i32_3 = arith.constant 0 : i32
    %11 = arith.cmpi ne, %10, %c0_i32_3 : i32
    scf.if %11 {
      %c0 = arith.constant 0 : index
      %c0_4 = arith.constant 0 : index
      %c0_5 = arith.constant 0 : index
      %12 = vector.load %arg11[%c0, %c0_4, %c0_5] : memref<4x32x1xf32, #tpu.memory_space<vmem>>, vector<1x32x1xf32>
      %13 = vector.shape_cast %12 : vector<1x32x1xf32> to vector<32x1xf32>
      %14 = tpu.reciprocal %13 {approx = true} : vector<32x1xf32> -> vector<32x1xf32>
      %15 = arith.mulf %13, %14 : vector<32x1xf32>
      %cst = arith.constant 2.000000e+00 : f32
      %16 = vector.broadcast %cst : f32 to vector<32x1xf32>
      %17 = arith.subf %16, %15 : vector<32x1xf32>
      %18 = arith.mulf %14, %17 : vector<32x1xf32>
      %c0_6 = arith.constant 0 : index
      %c0_7 = arith.constant 0 : index
      %c0_8 = arith.constant 0 : index
      %19 = vector.load %arg12[%c0_6, %c0_7, %c0_8] : memref<4x32x32xf32, #tpu.memory_space<vmem>>, vector<1x32x32xf32>
      %20 = vector.shape_cast %19 : vector<1x32x32xf32> to vector<32x32xf32>
      %21 = vector.broadcast %18 : vector<32x1xf32> to vector<32x32xf32>
      %22 = arith.mulf %20, %21 : vector<32x32xf32>
      %c1 = arith.constant 1 : index
      %c0_9 = arith.constant 0 : index
      %c0_10 = arith.constant 0 : index
      %23 = vector.load %arg11[%c1, %c0_9, %c0_10] : memref<4x32x1xf32, #tpu.memory_space<vmem>>, vector<1x32x1xf32>
      %24 = vector.shape_cast %23 : vector<1x32x1xf32> to vector<32x1xf32>
      %25 = tpu.reciprocal %24 {approx = true} : vector<32x1xf32> -> vector<32x1xf32>
      %26 = arith.mulf %24, %25 : vector<32x1xf32>
      %cst_11 = arith.constant 2.000000e+00 : f32
      %27 = vector.broadcast %cst_11 : f32 to vector<32x1xf32>
      %28 = arith.subf %27, %26 : vector<32x1xf32>
      %29 = arith.mulf %25, %28 : vector<32x1xf32>
      %c1_12 = arith.constant 1 : index
      %c0_13 = arith.constant 0 : index
      %c0_14 = arith.constant 0 : index
      %30 = vector.load %arg12[%c1_12, %c0_13, %c0_14] : memref<4x32x32xf32, #tpu.memory_space<vmem>>, vector<1x32x32xf32>
      %31 = vector.shape_cast %30 : vector<1x32x32xf32> to vector<32x32xf32>
      %32 = vector.broadcast %29 : vector<32x1xf32> to vector<32x32xf32>
      %33 = arith.mulf %31, %32 : vector<32x32xf32>
      %c2 = arith.constant 2 : index
      %c0_15 = arith.constant 0 : index
      %c0_16 = arith.constant 0 : index
      %34 = vector.load %arg11[%c2, %c0_15, %c0_16] : memref<4x32x1xf32, #tpu.memory_space<vmem>>, vector<1x32x1xf32>
      %35 = vector.shape_cast %34 : vector<1x32x1xf32> to vector<32x1xf32>
      %36 = tpu.reciprocal %35 {approx = true} : vector<32x1xf32> -> vector<32x1xf32>
      %37 = arith.mulf %35, %36 : vector<32x1xf32>
      %cst_17 = arith.constant 2.000000e+00 : f32
      %38 = vector.broadcast %cst_17 : f32 to vector<32x1xf32>
      %39 = arith.subf %38, %37 : vector<32x1xf32>
      %40 = arith.mulf %36, %39 : vector<32x1xf32>
      %c2_18 = arith.constant 2 : index
      %c0_19 = arith.constant 0 : index
      %c0_20 = arith.constant 0 : index
      %41 = vector.load %arg12[%c2_18, %c0_19, %c0_20] : memref<4x32x32xf32, #tpu.memory_space<vmem>>, vector<1x32x32xf32>
      %42 = vector.shape_cast %41 : vector<1x32x32xf32> to vector<32x32xf32>
      %43 = vector.broadcast %40 : vector<32x1xf32> to vector<32x32xf32>
      %44 = arith.mulf %42, %43 : vector<32x32xf32>
      %c3 = arith.constant 3 : index
      %c0_21 = arith.constant 0 : index
      %c0_22 = arith.constant 0 : index
      %45 = vector.load %arg11[%c3, %c0_21, %c0_22] : memref<4x32x1xf32, #tpu.memory_space<vmem>>, vector<1x32x1xf32>
      %46 = vector.shape_cast %45 : vector<1x32x1xf32> to vector<32x1xf32>
      %47 = tpu.reciprocal %46 {approx = true} : vector<32x1xf32> -> vector<32x1xf32>
      %48 = arith.mulf %46, %47 : vector<32x1xf32>
      %cst_23 = arith.constant 2.000000e+00 : f32
      %49 = vector.broadcast %cst_23 : f32 to vector<32x1xf32>
      %50 = arith.subf %49, %48 : vector<32x1xf32>
      %51 = arith.mulf %47, %50 : vector<32x1xf32>
      %c3_24 = arith.constant 3 : index
      %c0_25 = arith.constant 0 : index
      %c0_26 = arith.constant 0 : index
      %52 = vector.load %arg12[%c3_24, %c0_25, %c0_26] : memref<4x32x32xf32, #tpu.memory_space<vmem>>, vector<1x32x32xf32>
      %53 = vector.shape_cast %52 : vector<1x32x32xf32> to vector<32x32xf32>
      %54 = vector.broadcast %51 : vector<32x1xf32> to vector<32x32xf32>
      %55 = arith.mulf %53, %54 : vector<32x32xf32>
      %56 = tpu.concatenate %22, %33, %44, %55 in 1 : vector<32x32xf32>, vector<32x32xf32>, vector<32x32xf32>, vector<32x32xf32> -> vector<32x128xf32>
      %c0_27 = arith.constant 0 : index
      %c0_28 = arith.constant 0 : index
      %c0_29 = arith.constant 0 : index
      %57 = vector.load %arg8[%c0_27, %c0_28, %c0_29] : memref<1x32x128xf32, #tpu.memory_space<vmem>>, vector<1x32x128xf32>
      %58 = vector.shape_cast %57 : vector<1x32x128xf32> to vector<32x128xf32>
      %59 = vector.shape_cast %56 : vector<32x128xf32> to vector<1x32x128xf32>
      tpu.vector_store %arg8[%c0_27, %c0_28, %c0_29], %59 {strides = array<i32>} : memref<1x32x128xf32, #tpu.memory_space<vmem>>, vector<1x32x128xf32>,
    } else {
    }
    return
  }
  func.func @transform_0(%arg0: i32, %arg1: i32, %arg2: i32) -> (i32, i32, i32) {
    %c0_i32 = arith.constant 0 : i32
    %c0_i32_0 = arith.constant 0 : i32
    return %arg0, %arg1, %c0_i32 : i32, i32, i32
  }
  func.func @transform_1(%arg0: i32, %arg1: i32, %arg2: i32) -> (i32, i32, i32) {
    %c0_i32 = arith.constant 0 : i32
    %c0_i32_0 = arith.constant 0 : i32
    return %arg0, %arg2, %c0_i32 : i32, i32, i32
  }
  func.func @transform_2(%arg0: i32, %arg1: i32, %arg2: i32) -> (i32, i32) {
    %c0_i32 = arith.constant 0 : i32
    %c0_i32_0 = arith.constant 0 : i32
    %c0_i32_1 = arith.constant 0 : i32
    return %c0_i32, %c0_i32_0 : i32, i32
  }
  func.func @transform_3(%arg0: i32, %arg1: i32, %arg2: i32) -> (i32, i32) {
    %c0_i32 = arith.constant 0 : i32
    %c0_i32_0 = arith.constant 0 : i32
    %c0_i32_1 = arith.constant 0 : i32
    return %c0_i32, %c0_i32_0 : i32, i32
  }
  func.func @transform_4(%arg0: i32, %arg1: i32, %arg2: i32) -> (i32, i32) {
    %c0_i32 = arith.constant 0 : i32
    %c0_i32_0 = arith.constant 0 : i32
    %c0_i32_1 = arith.constant 0 : i32
    return %c0_i32, %c0_i32_0 : i32, i32
  }
  func.func @transform_5(%arg0: i32, %arg1: i32, %arg2: i32) -> (i32, i32, i32) {
    %c0_i32 = arith.constant 0 : i32
    %c0_i32_0 = arith.constant 0 : i32
    return %arg0, %arg1, %c0_i32 : i32, i32, i32
  }
}

</mosaic_0001>

<bundles_post_ra>
// kernel: tpu_custom_call.1
= control target key start
LH: loop header
LB: loop body
LE: loop exit
PB: predicated region body
PF: predicated region fallthrough
CT: control target
= control target key end

     0   :  { %10 = vsyncpa [#allocation7], 0  ;;  %s4456_s0 = inlined_call_operand.vmem [shape: f32[2,128,64], index: 0, kind: input, shape index: {}]   ;;  %s4457_s1 = inlined_call_operand.vmem [shape: f32[2,128,64], index: 1, kind: input, shape index: {}]   ;;  %s4458_s2 = inlined_call_operand.vmem [shape: f32[64,128], index: 2, kind: input, shape index: {}]   ;;  %s4459_s3 = inlined_call_operand.vmem [shape: f32[64,128], index: 3, kind: input, shape index: {}]   ;;  %s4460_s4 = inlined_call_operand.vmem [shape: f32[64,128], index: 4, kind: input, shape index: {}]   ;;  %s4461_s5 = inlined_call_operand.hbm [shape: f32[2,128,128], index: 5, kind: output, shape index: {}]  }
   0x1   :  { %12 = vsyncpa [#allocation7 + $0x1], 0  ;;  %s3446_s18 = smov 0   ;;  %s3448_s19 = smov 0  }
   0x2   :  { %s3450_s20 = smov 0   ;;  %s3452_s21 = smov 0  }
   0x3   :  { %s3454_s22 = smov 0   ;;  %s3456_s23 = smov 0  }
   0x4   :  { %s3458_s24 = smov 0   ;;  %s3460_s25 = smov 0  }
   0x5   :  { %s3462_s26 = smov 0   ;;  %s3464_s27 = smov 0  }
   0x6 LB: > { %4470 = sst [smem:[#allocation9_spill]] %s3373_s20  ;;  %s2535_s28 = sadd.s32 4294967295, %s3401_s27   ;;  %s3401_s27 = sphi %s3464_s27, %s18_s27   ;;  %s3397_s26 = sphi %s3462_s26, %s4515_s26   ;;  %s3393_s25 = sphi %s3460_s25, %s4514_s25   ;;  %s3389_s24 = sphi %s3458_s24, %s4519_s24   ;;  %s3385_s23 = sphi %s3456_s23, %s4512_s23   ;;  %s3381_s22 = sphi %s3454_s22, %s4511_s22   ;;  %s3377_s21 = sphi %s3452_s21, %s4510_s21   ;;  %s3373_s20 = sphi %s3450_s20, %s4518_s20   ;;  %s3369_s19 = sphi %s3448_s19, %s4517_s19   ;;  %s3365_s18 = sphi %s3446_s18, %s4516_s18  }
   0x7   : > { %4471 = sst [smem:[#allocation10_spill]] %s3389_s24  ;;  %s2536_s29 = sadd.s32 4294967294, %s3401_s27  }
   0x8   : > { %4472 = sst [smem:[#allocation11_spill]] %s3393_s25  ;;  %s30_s30 = sadd.s32 1, %s3389_s24 }
   0x9   : > { %4473 = sst [smem:[#allocation12_spill]] %s3397_s26  ;;  %p31_p0 = scmp.ge.s32.totalorder %s30_s30, 4 }
   0xa   : > { %s33_s6 = sadd.s32 1, %s3393_s25  ;;  %s37_s7 = sadd.s32 1, %s3397_s26 }
   0xb   : > { %p175_p1 = scmp.ne.s32.totalorder %s3373_s20, %s3369_s19  ;;  %s4521_s30 = smov (%p31_p0, %s30_s30), 0 }
   0xc   : > { %4474 = sst [smem:[#allocation13_spill]] %s4521_s30  ;;  %s4523_s6 = smov (!%p31_p0, %s33_s6), %s3393_s25 }
   0xd   : > { %p176_p2 = scmp.eq.s32.totalorder %s2535_s28, 31  ;;  %p181_p3 = scmp.ne.s32.totalorder %s3369_s19, %s3365_s18 }
   0xe   : > { %p35_p4 = scmp.ge.s32.totalorder %s4523_s6, 4  ;;  %p182_p5 = scmp.eq.s32.totalorder %s2536_s29, 31 }
   0xf   : > { %p3508_p6 = por %p176_p2, %p175_p1  ;;  %p2539_p8 = scmp.ge.s32.totalorder %s3401_s27, 1 }
  0x10   : > { %s4525_s6 = smov (%p35_p4, %s4523_s6), 0  ;;  %s4527_s7 = smov (!%p35_p4, %s37_s7), %s3397_s26 }
  0x11   : > { %4476 = sst [smem:[#allocation14_spill]] %s4525_s6  ;;  %p3515_p7 = por %p182_p5, %p181_p3 }
  0x12   : > { %p39_p9 = scmp.ge.s32.totalorder %s4527_s7, 2  ;;  %p235_p10 = scmp.lt.s32.totalorder %s3401_s27, 33 }
  0x13   : > { %s4477_s9 = scalar_select %p3515_p7, 1, 0 }
  0x14   : > { %s161_s10 = ssub.s32 %s3393_s25, %s4525_s6  ;;  %s4529_s7 = smov (%p39_p9, %s4527_s7), 0 }
  0x15   : > { %4478 = sst [smem:[#allocation15_spill]] %s4477_s9  ;;  %p236_p11 = pnand %p2539_p8, %p235_p10 }
  0x16   : > { %4479 = sst [smem:[#allocation16_spill]] %s4529_s7  ;;  %s160_s11 = ssub.s32 %s3397_s26, %s4529_s7 }
  0x17   : > { %s162_s12 = sor.u32 %s161_s10, %s160_s11  ;;  %s165_s13 = sadd.s32 1, %s3373_s20 }
  0x18   : > { %p163_p12 = scmp.eq.s32.totalorder %s162_s12, 0  ;;  %239 = sbr.rel (%p236_p11) target bundleno = 3148 (0xc4c), region = 40 }
  0x19   : > { %s4467_s15 = sand.u32 (!%p236_p11), 1, %s3369_s19   ;;  %s3533_s16 = sshll.u32 (!%p236_p11), %s3381_s22, 2 }
  0x1a   : > { %s3529_s14 = scalar_select %p163_p12, %s3373_s20, %s165_s13  }
  0x1b   : > { %s2540_s17 = sshll.u32 (!%p236_p11), %s4467_s15, 5  ;;  %p277_p13 = scmp.lt.s32.totalorder (!%p236_p11), %s3385_s23, 1 }
  0x1c   : > { %4480 = sst [smem:[#allocation17_spill]] %s3529_s14  ;;  %p279_p0 = scmp.lt.s32.totalorder (!%p236_p11), %s3533_s16, 15 }
  0x1d   : > { %s2544_s11 = sshll.u32 (!%p236_p11), %s3377_s21, 2  ;;  %s2547_s7 = sshll.u32 (!%p236_p11), %s3381_s22, 5 }
  0x1e   : > { %p289_p1 = scmp.lt.s32.totalorder (!%p236_p11), %s2544_s11, 15  ;;  %s2548_s25 = sshll.u32 (!%p236_p11), %s3377_s21, 5 }
  0x1f   : > { %s278_s28 = scalar_select %p277_p13, %s3385_s23, 1 }
  0x20   : > { %s280_s29 = scalar_select %p279_p0, %s3533_s16, 15 }
  0x21   : > { %s2542_s10 = sshll.u32 %s278_s28, 4  ;;  %s4531_s11 = smov (!%p289_p1, %s2544_s11), 15 }
  0x22   : > { %s282_s12 = sadd.s32 %s2542_s10, %s280_s29  ;;  %s292_s24 = sadd.s32 %s2542_s10, %s4531_s11 }
  0x23   : > { %s2543_s13 = sshll.u32 %s282_s12, 3  ;;  %s2546_s14 = sshll.u32 %s292_s24, 3 }
  0x24   : > { %s3546_s26 = scalar_lea.vmem %s4456_s0, %s2543_s13  ;;  %s3552_s9 = scalar_lea.vmem %s4457_s1, %s2546_s14 }
  0x25   : > { %s3554_s28 = scalar_lea.vmem [#allocation6], %s2540_s17  ;;  %p2549_p2 = scmp.ne.s32.totalorder %s3377_s21, 0 }
  0x26   : > { %vm303_vm0 = vcmask (!%p2549_p2), 7168   ;;  %vm336_vm1 = vcmask (!%p2549_p2), 261120   ;;  %v357_v0 = vld [vmem:[%s4458_s2] sm:$0xff] (!%p2549_p2)  ;;  %v3403_v1 = vmov (!%p2549_p2), -1e+30   ;;  %v3404_v2 = vmov (!%p2549_p2), 0.0  }
  0x27   : > { %302 = sbr.rel (%p2549_p2) target bundleno = 274 (0x112), region = 44  ;;  %304 = vst.msk [vmem:[#allocation3] sm:$0xff] (!%p2549_p2), %vm303_vm0, %v3403_v1  ;;  %305 = vst.msk [vmem:[#allocation3 + $0x8] sm:$0xff] (!%p2549_p2), %vm303_vm0, %v3403_v1  ;;  %v358_v3 = vld [vmem:[%s4458_s2 + $0x8] sm:$0xff] (!%p2549_p2)  ;;  %v359_v4 = vld [vmem:[%s4458_s2 + $0x10] sm:$0xff] (!%p2549_p2)  ;;  %vm365_vm2 = vcmask (!%p2549_p2), 523264  }
  0x28   : > { %306 = vst.msk [vmem:[#allocation3 + $0x10] sm:$0xff] (!%p2549_p2), %vm303_vm0, %v3403_v1  ;;  %307 = vst.msk [vmem:[#allocation3 + $0x18] sm:$0xff] (!%p2549_p2), %vm303_vm0, %v3403_v1  ;;  %v360_v5 = vld [vmem:[%s4458_s2 + $0x18] sm:$0xff] (!%p2549_p2)  ;;  %v2896_v6 = vpack.c.bf16 (!%p2549_p2), %v358_v3, %v357_v0  ;;  %v361_v8 = vld [vmem:[%s4458_s2 + $0x20] sm:$0xff] (!%p2549_p2) }
  0x29   : > { %308 = vst.msk [vmem:[#allocation3 + $0x20] sm:$0xff] (!%p2549_p2), %vm303_vm0, %v3403_v1  ;;  %309 = vst.msk [vmem:[#allocation3 + $0x28] sm:$0xff] (!%p2549_p2), %vm303_vm0, %v3403_v1  ;;  %v2900_v7 = vpack.c.bf16 (!%p2549_p2), %v360_v5, %v359_v4  ;;  %v362_v9 = vld [vmem:[%s4458_s2 + $0x28] sm:$0xff] (!%p2549_p2)  ;;  %v353_v10 = vld [vmem:[%s3546_s26] sm:$0xff] (!%p2549_p2) }
  0x2a   : > { %310 = vst.msk [vmem:[#allocation3 + $0x30] sm:$0xff] (!%p2549_p2), %vm303_vm0, %v3403_v1  ;;  %311 = vst.msk [vmem:[#allocation3 + $0x38] sm:$0xff] (!%p2549_p2), %vm303_vm0, %v3403_v1  ;;  %2897 = vmatprep.subr.bf16.mxu0 (!%p2549_p2), %v2896_v6  ;;  %3024 = vmatprep.subr.bf16.mxu1 (!%p2549_p2), %v2896_v6  ;;  %v355_v11 = vld [vmem:[%s3546_s26 + $0x10] sm:$0xff] (!%p2549_p2)  ;;  %v2904_v12 = vpack.c.bf16 (!%p2549_p2), %v362_v9, %v361_v8  ;;  %v364_v14 = vld [vmem:[%s4458_s2 + $0x38] sm:$0xff] (!%p2549_p2) }
  0x2b   : > { %312 = vst.msk [vmem:[#allocation3 + $0x40] sm:$0xff] (!%p2549_p2), %vm303_vm0, %v3403_v1  ;;  %313 = vst.msk [vmem:[#allocation3 + $0x48] sm:$0xff] (!%p2549_p2), %vm303_vm0, %v3403_v1  ;;  %2899 = vmatpush3.bf16.msra.mxu0 (!%p2549_p2), %v2896_v6  ;;  %3028 = vmatpush3.bf16.msra.mxu1 (!%p2549_p2), %v2896_v6  ;;  %v363_v13 = vld [vmem:[%s4458_s2 + $0x30] sm:$0xff] (!%p2549_p2)  ;;  %v354_v16 = vld [vmem:[%s3546_s26 + $0x8] sm:$0xff] (!%p2549_p2) }
  0x2c   : > { %314 = vst.msk [vmem:[#allocation3 + $0x50] sm:$0xff] (!%p2549_p2), %vm303_vm0, %v3403_v1  ;;  %315 = vst.msk [vmem:[#allocation3 + $0x58] sm:$0xff] (!%p2549_p2), %vm303_vm0, %v3403_v1  ;;  %2901 = vmatprep.subr.bf16.mxu0 (!%p2549_p2), %v2900_v7  ;;  %3025 = vmatprep.subr.bf16.mxu1 (!%p2549_p2), %v2900_v7  ;;  %v2908_v15 = vpack.c.bf16 (!%p2549_p2), %v364_v14, %v363_v13  ;;  %v356_v17 = vld [vmem:[%s3546_s26 + $0x18] sm:$0xff] (!%p2549_p2) }
  0x2d   : > { %316 = vst.msk [vmem:[#allocation3 + $0x60] sm:$0xff] (!%p2549_p2), %vm303_vm0, %v3403_v1  ;;  %317 = vst.msk [vmem:[#allocation3 + $0x68] sm:$0xff] (!%p2549_p2), %vm303_vm0, %v3403_v1  ;;  %2734 = vmatprep.mubr.msk.f32.mxu0 (!%p2549_p2), %vm365_vm2, %v353_v10  ;;  %2737 = vmatprep.mubr.msk.f32.mxu1 (!%p2549_p2), %vm365_vm2, %v355_v11 }
  0x2e   : > { %318 = vst.msk [vmem:[#allocation3 + $0x70] sm:$0xff] %vm303_vm0, %v3403_v1  ;;  %319 = vst.msk [vmem:[#allocation3 + $0x78] sm:$0xff] %vm303_vm0, %v3403_v1 }
  0x2f   : > { %320 = vst.msk [vmem:[#allocation4] sm:$0xff] %vm303_vm0, %v3404_v2  ;;  %321 = vst.msk [vmem:[#allocation4 + $0x8] sm:$0xff] %vm303_vm0, %v3404_v2  ;;  %2903 = vmatpush3.bf16.msra.mxu0 %v2900_v7  ;;  %3029 = vmatpush3.bf16.msra.mxu1 %v2900_v7 }
  0x30   : > { %322 = vst.msk [vmem:[#allocation4 + $0x10] sm:$0xff] %vm303_vm0, %v3404_v2  ;;  %323 = vst.msk [vmem:[#allocation4 + $0x18] sm:$0xff] %vm303_vm0, %v3404_v2  ;;  %2905 = vmatprep.subr.bf16.mxu0 %v2904_v12  ;;  %3026 = vmatprep.subr.bf16.mxu1 %v2904_v12 }
  0x31   : > { %324 = vst.msk [vmem:[#allocation4 + $0x20] sm:$0xff] %vm303_vm0, %v3404_v2  ;;  %325 = vst.msk [vmem:[#allocation4 + $0x28] sm:$0xff] %vm303_vm0, %v3404_v2 }
  0x32   : > { %326 = vst.msk [vmem:[#allocation4 + $0x30] sm:$0xff] %vm303_vm0, %v3404_v2  ;;  %327 = vst.msk [vmem:[#allocation4 + $0x38] sm:$0xff] %vm303_vm0, %v3404_v2 }
  0x33   : > { %328 = vst.msk [vmem:[#allocation4 + $0x40] sm:$0xff] %vm303_vm0, %v3404_v2  ;;  %329 = vst.msk [vmem:[#allocation4 + $0x48] sm:$0xff] %vm303_vm0, %v3404_v2  ;;  %2907 = vmatpush3.bf16.msra.mxu0 %v2904_v12  ;;  %3030 = vmatpush3.bf16.msra.mxu1 %v2904_v12 }
  0x34   : > { %330 = vst.msk [vmem:[#allocation4 + $0x50] sm:$0xff] %vm303_vm0, %v3404_v2  ;;  %331 = vst.msk [vmem:[#allocation4 + $0x58] sm:$0xff] %vm303_vm0, %v3404_v2  ;;  %2909 = vmatprep.subr.bf16.mxu0 %v2908_v15  ;;  %3027 = vmatprep.subr.bf16.mxu1 %v2908_v15 }
  0x35   : > { %332 = vst.msk [vmem:[#allocation4 + $0x60] sm:$0xff] %vm303_vm0, %v3404_v2  ;;  %333 = vst.msk [vmem:[#allocation4 + $0x68] sm:$0xff] %vm303_vm0, %v3404_v2 }
  0x36   : > { %334 = vst.msk [vmem:[#allocation4 + $0x70] sm:$0xff] %vm303_vm0, %v3404_v2  ;;  %335 = vst.msk [vmem:[#allocation4 + $0x78] sm:$0xff] %vm303_vm0, %v3404_v2 }
  0x37   : > { %337 = vst.msk [vmem:[#allocation5] sm:$0xff] %vm336_vm1, %v3404_v2  ;;  %338 = vst.msk [vmem:[#allocation5 + $0x8] sm:$0xff] %vm336_vm1, %v3404_v2  ;;  %2911 = vmatpush3.bf16.msra.mxu0 %v2908_v15  ;;  %3031 = vmatpush3.bf16.msra.mxu1 %v2908_v15 }
  0x38   : > { %339 = vst.msk [vmem:[#allocation5 + $0x10] sm:$0xff] %vm336_vm1, %v3404_v2  ;;  %340 = vst.msk [vmem:[#allocation5 + $0x18] sm:$0xff] %vm336_vm1, %v3404_v2 }
  0x39   : > { %341 = vst.msk [vmem:[#allocation5 + $0x20] sm:$0xff] %vm336_vm1, %v3404_v2  ;;  %342 = vst.msk [vmem:[#allocation5 + $0x28] sm:$0xff] %vm336_vm1, %v3404_v2 }
  0x3a   : > { %343 = vst.msk [vmem:[#allocation5 + $0x30] sm:$0xff] %vm336_vm1, %v3404_v2  ;;  %344 = vst.msk [vmem:[#allocation5 + $0x38] sm:$0xff] %vm336_vm1, %v3404_v2  ;;  %2735 = vmatmul.mubr.msk.f32.vlgmr.msra.gmra.mrb[0].mxu0 %vm365_vm2, %v354_v16  ;;  %2738 = vmatmul.mubr.msk.f32.vlgmr.msra.gmra.mrb[0].mxu1 %vm365_vm2, %v356_v17 }
  0x3b   : > { %345 = vst.msk [vmem:[#allocation5 + $0x40] sm:$0xff] %vm336_vm1, %v3404_v2  ;;  %346 = vst.msk [vmem:[#allocation5 + $0x48] sm:$0xff] %vm336_vm1, %v3404_v2 }
  0x3c   : > { %347 = vst.msk [vmem:[#allocation5 + $0x50] sm:$0xff] %vm336_vm1, %v3404_v2  ;;  %348 = vst.msk [vmem:[#allocation5 + $0x58] sm:$0xff] %vm336_vm1, %v3404_v2 }
  0x3d   : > { %349 = vst.msk [vmem:[#allocation5 + $0x60] sm:$0xff] %vm336_vm1, %v3404_v2  ;;  %350 = vst.msk [vmem:[#allocation5 + $0x68] sm:$0xff] %vm336_vm1, %v3404_v2 }
  0x3e   : > { %351 = vst.msk [vmem:[#allocation5 + $0x70] sm:$0xff] %vm336_vm1, %v3404_v2  ;;  %352 = vst.msk [vmem:[#allocation5 + $0x78] sm:$0xff] %vm336_vm1, %v3404_v2 }
 0x10d   : > { %v2736_v18 = vpop.f32.mrb[0].mxu0  ;;  %v2739_v19 = vpop.f32.mrb[0].mxu1 }
 0x10e   : > { %v464_v20 = vmul.f32 0.17677669, %v2736_v18  ;;  %v466_v21 = vmul.f32 0.17677669, %v2739_v19  ;;  %v444_v22 = vpop.f32.mrb[1].mxu0  ;;  %v454_v23 = vpop.f32.mrb[1].mxu1 }
 0x10f   : > { %v463_v24 = vmul.f32 0.17677669, %v444_v22  ;;  %v465_v25 = vmul.f32 0.17677669, %v454_v23 }
 0x110   : > { %468 = vst [vmem:[#allocation2 + $0x8] sm:$0xff] %v464_v20  ;;  %470 = vst [vmem:[#allocation2 + $0x18] sm:$0xff] %v466_v21 }
 0x111   : > { %467 = vst [vmem:[#allocation2] sm:$0xff] %v463_v24  ;;  %469 = vst [vmem:[#allocation2 + $0x10] sm:$0xff] %v465_v25 }
 0x112 PF: > { %s471_s26 = sadd.s32 31, %s2547_s7 }
 0x113   : > { %p2554_p3 = scmp.gt.s32.totalorder %s2548_s25, %s471_s26 }
 0x115   : > { %475 = sbr.rel (%p2554_p3) target bundleno = 2830 (0xb0e), region = 48 }
 0x11c   : > { %v480_v26 = vld [vmem:[%s4459_s3] sm:$0xff]  ;;  %v481_v27 = vld [vmem:[%s4459_s3 + $0x8] sm:$0xff]  ;;  %v482_v28 = vld [vmem:[%s4459_s3 + $0x10] sm:$0xff]  ;;  %vm488_vm3 = vcmask 523264   ;;  %vm701_vm4 = vcmask 261120   ;;  %v683_v3 = vlaneseq  ;;  %v688_v6 = vstv %s2547_s7  ;;  %s3406_s22 = smov 96  }
 0x11d   : > { %v2912_v29 = vpack.c.bf16 %v481_v27, %v480_v26  ;;  %v483_v30 = vld [vmem:[%s4459_s3 + $0x18] sm:$0xff]  ;;  %v484_v32 = vld [vmem:[%s4459_s3 + $0x20] sm:$0xff]  ;;  %v485_v33 = vld [vmem:[%s4459_s3 + $0x28] sm:$0xff]  ;;  %v695_v7 = vstv %s2548_s25  ;;  %vm903_vm10 = vcmask 7168   ;;  %s3407_s25 = smov 64   ;;  %s3408_s7 = smov 32  }
 0x11e   : > { %v2916_v31 = vpack.c.bf16 %v483_v30, %v482_v28  ;;  %v476_v34 = vld [vmem:[%s3552_s9] sm:$0xff]  ;;  %v2920_v35 = vpack.c.bf16 %v485_v33, %v484_v32  ;;  %v486_v36 = vld [vmem:[%s4459_s3 + $0x30] sm:$0xff]  ;;  %v487_v37 = vld [vmem:[%s4459_s3 + $0x38] sm:$0xff]  ;;  %v684_v4 = vshrl.u32 %v683_v3, 7  ;;  %v694_v5 = vand.u32 127, %v683_v3 }
 0x11f   : > { %2913 = vmatprep.subr.bf16.mxu0 %v2912_v29  ;;  %2756 = vmatprep.mubr.msk.f32.mxu0 %vm488_vm3, %v476_v34  ;;  %v2924_v38 = vpack.c.bf16 %v487_v37, %v486_v36  ;;  %v477_v39 = vld [vmem:[%s3552_s9 + $0x8] sm:$0xff]  ;;  %v478_v40 = vld [vmem:[%s3552_s9 + $0x10] sm:$0xff]  ;;  %v479_v41 = vld [vmem:[%s3552_s9 + $0x18] sm:$0xff]  ;;  %v3405_v28 = vmov 0  }
 0x120   : > { %2915 = vmatpush3.bf16.msra.mxu0 %v2912_v29  ;;  %2778 = vmatprep.mubr.msk.f32.mxu1 %vm488_vm3, %v476_v34  ;;  %v3674_v42 = vld [vmem:[#allocation2] sm:$0xff]  ;;  %vm3680_vm5 = vmpackc.low %vm701_vm4, %vm701_vm4  ;;  %v3696_v52 = vld [vmem:[#allocation2 + $0x8] sm:$0xff]  ;;  %v685_v8 = vadd.s32 8, %v684_v4  ;;  %v3739_v9 = vadd.s32 %v695_v7, %v694_v5  ;;  %v3741_v10 = vadd.s32 %v688_v6, %v684_v4  ;;  %v687_v11 = vadd.s32 24, %v684_v4 }
 0x121   : > { %2917 = vmatprep.subr.bf16.mxu0 %v2916_v31  ;;  %v3698_v53 = vld [vmem:[#allocation2 + $0x10] sm:$0xff]  ;;  %v3704_v54 = vld [vmem:[#allocation2 + $0x18] sm:$0xff]  ;;  %v586_v55 = vld [vmem:[%s4460_s4] sm:$0xff]  ;;  %v686_v12 = vadd.s32 16, %v684_v4  ;;  %3131 = vset.pattern.permute.xlu0 %v3405_v28 }
 0x122   : > { %v587_v56 = vld [vmem:[%s4460_s4 + $0x8] sm:$0xff]  ;;  %v588_v57 = vld [vmem:[%s4460_s4 + $0x10] sm:$0xff]  ;;  %v589_v59 = vld [vmem:[%s4460_s4 + $0x18] sm:$0xff]  ;;  %v3743_v13 = vadd.s32 %v688_v6, %v685_v8  ;;  %vm697_vm6 = vcmp.le.s32.totalorder %v3739_v9, %v3741_v10  ;;  %v3747_v14 = vadd.s32 %v688_v6, %v687_v11  ;;  %3132 = vset.pattern.permute.xlu1 %v3405_v28 }
 0x123   : > { %v2928_v58 = vpack.c.bf16 %v587_v56, %v586_v55  ;;  %v2932_v60 = vpack.c.bf16 %v589_v59, %v588_v57  ;;  %v590_v61 = vld [vmem:[%s4460_s4 + $0x20] sm:$0xff]  ;;  %v591_v62 = vld [vmem:[%s4460_s4 + $0x28] sm:$0xff]  ;;  %v592_v0 = vld [vmem:[%s4460_s4 + $0x30] sm:$0xff]  ;;  %v3749_v15 = vadd.s32 %v688_v6, %v686_v12 }
 0x124   : > { %2919 = vmatpush3.bf16.msra.mxu0 %v2916_v31  ;;  %v2936_v63 = vpack.c.bf16 %v591_v62, %v590_v61  ;;  %v593_v1 = vld [vmem:[%s4460_s4 + $0x38] sm:$0xff]  ;;  %vm698_vm7 = vcmp.le.s32.totalorder %v3739_v9, %v3743_v13  ;;  %vm700_vm8 = vcmp.le.s32.totalorder %v3739_v9, %v3747_v14  ;;  %v3785_v29 = vld [vmem:[#allocation3] sm:$0xff]  ;;  %v3790_v32 = vld [vmem:[#allocation3 + $0x8] sm:$0xff] }
 0x125   : > { %2921 = vmatprep.subr.bf16.mxu0 %v2920_v35  ;;  %2929 = vmatprep.subr.bf16.mxu1 %v2928_v58  ;;  %v2940_v2 = vpack.c.bf16 %v593_v1, %v592_v0  ;;  %vm699_vm9 = vcmp.le.s32.totalorder %v3739_v9, %v3749_v15  ;;  %v3792_v33 = vld [vmem:[#allocation3 + $0x10] sm:$0xff] }
 0x126   : > { %2931 = vmatpush3.bf16.msra.mxu1 %v2928_v58 }
 0x127   : > { %2933 = vmatprep.subr.bf16.mxu1 %v2932_v60 }
 0x128   : > { %2923 = vmatpush3.bf16.msra.mxu0 %v2920_v35 }
 0x129   : > { %2925 = vmatprep.subr.bf16.mxu0 %v2924_v38 }
 0x12a   : > { %2935 = vmatpush3.bf16.msra.mxu1 %v2932_v60 }
 0x12b   : > { %2937 = vmatprep.subr.bf16.mxu1 %v2936_v63 }
 0x12c   : > { %2927 = vmatpush3.bf16.msra.mxu0 %v2924_v38 }
 0x12e   : > { %2939 = vmatpush3.bf16.msra.mxu1 %v2936_v63 }
 0x12f   : > { %2757 = vmatmul.mubr.msk.f32.vlgmr.msra.gmra.mrb[0].mxu0 %vm488_vm3, %v477_v39  ;;  %2941 = vmatprep.subr.bf16.mxu1 %v2940_v2 }
 0x130   : > { %2759 = vmatprep.mubr.msk.f32.mxu0 %vm488_vm3, %v478_v40 }
 0x132   : > { %2943 = vmatpush3.bf16.msra.mxu1 %v2940_v2 }
 0x133   : > { %2760 = vmatmul.mubr.msk.f32.gmra.mrb[2].mxu0 %vm488_vm3, %v479_v41 }
 0x134   : > { %2792 = vmatprep.mubr.msk.f32.mxu0 %vm701_vm4, %v3674_v42 }
 0x135   : > { %2779 = vmatmul.mubr.msk.f32.vlgmr.msra.gmra.mrb[0].mxu1 %vm488_vm3, %v477_v39 }
 0x136   : > { %2781 = vmatprep.mubr.msk.f32.mxu1 %vm488_vm3, %v478_v40  ;;  %v3805_v40 = vld [vmem:[#allocation3 + $0x18] sm:$0xff] }
 0x139   : > { %2782 = vmatmul.mubr.msk.f32.gmra.mrb[2].mxu1 %vm488_vm3, %v479_v41 }
 0x202   : > { %v2758_v43 = vpop.f32.mrb[0].mxu0 }
 0x203   : > { %v567_v44 = vpop.f32.mrb[1].mxu0 }
 0x204   : > { %v2944_v46 = vpack.c.bf16 %v2758_v43, %v567_v44  ;;  %v3684_v47 = vpack.i.bf16 %v2758_v43, %v567_v44 }
 0x206   : > { %2946 = vmatprep.subr.msk.bf16.mxu0 %vm3680_vm5, %v2944_v46  ;;  %v2761_v48 = vpop.f32.mrb[2].mxu0 }
 0x207   : > { %2949 = vmatpush3.bf16.xpose.msk.msra.mxu0 %vm3680_vm5, %v2944_v46  ;;  %v577_v49 = vpop.f32.mrb[3].mxu0 }
 0x208   : > { %v2950_v50 = vpack.c.bf16 %v2761_v48, %v577_v49  ;;  %v3690_v51 = vpack.i.bf16 %v2761_v48, %v577_v49  ;;  %v2780_v39 = vpop.f32.mrb[0].mxu1 }
 0x209   : > { %v660_v41 = vpop.f32.mrb[1].mxu1 }
 0x20a   : > { %2952 = vmatprep.subr.msk.bf16.mxu0 %vm3680_vm5, %v2950_v50  ;;  %v2956_v46 = vpack.c.bf16 %v2780_v39, %v660_v41 }
 0x20c   : > { %v2783_v49 = vpop.f32.mrb[2].mxu1  ;;  %2957 = vmatprep.subr.bf16.mxu1 %v2956_v46 }
 0x20d   : > { %v670_v56 = vpop.f32.mrb[3].mxu1  ;;  %2959 = vmatpush3.bf16.msra.mxu1 %v2956_v46 }
 0x20e   : > { %v2960_v57 = vpack.c.bf16 %v2783_v49, %v670_v56  ;;  %v3828_v59 = vpack.i.bf16 %v2783_v49, %v670_v56 }
 0x20f   : > { %2955 = vmatpush3.bf16.xpose.msk.msra.mxu0 %vm3680_vm5, %v2950_v50  ;;  %v3818_v50 = vpack.i.bf16 %v2780_v39, %v660_v41 }
 0x210   : > { %2961 = vmatprep.subr.bf16.mxu1 %v2960_v57 }
 0x211   : > { %2963 = vmatpush3.bf16.msra.mxu1 %v2960_v57 }
 0x216   : > { %2793 = vmatmul.mubr.msk.f32.vlgmr.msra.gmra.mrb[4].mxu0 %vm701_vm4, %v3696_v52 }
 0x217   : > { %2795 = vmatprep.mubr.msk.f32.mxu0 %vm701_vm4, %v3698_v53 }
 0x21a   : > { %2796 = vmatmul.mubr.msk.f32.gmra.mrb[6].mxu0 %vm701_vm4, %v3704_v54 }
 0x2e9   : > { %v2794_v16 = vpop.f32.mrb[4].mxu0 }
 0x2ea   : > { %v792_v17 = vpop.f32.mrb[5].mxu0  ;;  %v3767_v20 = vsel %vm698_vm7, %v2794_v16, -1e+30 }
 0x2eb   : > { %v3756_v18 = vsel %vm697_vm6, %v792_v17, -1e+30  ;;  %v822_v25 = vsel %vm701_vm4, %v3767_v20, -inf }
 0x2ec   : > { %v819_v19 = vsel %vm701_vm4, %v3756_v18, -inf }
 0x2ed   : > { %820 = vmax.xlane.f32.xlu0 %v819_v19  ;;  %v2797_v21 = vpop.f32.mrb[6].mxu0 }
 0x2ee   : > { %v802_v22 = vpop.f32.mrb[7].mxu0  ;;  %v3772_v23 = vsel %vm700_vm8, %v2797_v21, -1e+30 }
 0x2ef   : > { %v3777_v24 = vsel %vm699_vm9, %v802_v22, -1e+30  ;;  %v828_v27 = vsel %vm701_vm4, %v3772_v23, -inf }
 0x2f0   : > { %v825_v26 = vsel %vm701_vm4, %v3777_v24, -inf }
 0x2f1   : > { %823 = vmax.xlane.f32.xlu0 %v822_v25  ;;  %826 = vmax.xlane.f32.xlu1 %v825_v26 }
 0x2f5   : > { %829 = vmax.xlane.f32.xlu1 %v828_v27 }
 0x37a   : > { %v821_v30 = vpop.xlane.xlu0 %820 }
 0x37b   : > { %v3788_v31 = vmax.f32 %v3785_v29, %v821_v30 }
 0x37d   : > { %1041 = vst.msk [vmem:[#allocation3] sm:$0xff] %vm903_vm10, %v3788_v31  ;;  %849 = vperm.xlu0 %3131, %v3788_v31  }
 0x37e   : > { %v824_v35 = vpop.xlane.xlu0 %823  ;;  %v827_v36 = vpop.xlane.xlu1 %826 }
 0x37f   : > { %v3800_v37 = vmax.f32 %v3790_v32, %v824_v35  ;;  %v3803_v38 = vmax.f32 %v3792_v33, %v827_v36 }
 0x381   : > { %1042 = vst.msk [vmem:[#allocation3 + $0x8] sm:$0xff] %vm903_vm10, %v3800_v37  ;;  %1043 = vst.msk [vmem:[#allocation3 + $0x10] sm:$0xff] %vm903_vm10, %v3803_v38  ;;  %854 = vperm.xlu1 %3132, %v3800_v37   ;;  %1051 = vrot.lane.b32.xlu0 %v3704_v54, %s3406_s22 }
 0x382   : > { %v830_v48 = vpop.xlane.xlu1 %829 }
 0x383   : > { %v3821_v55 = vmax.f32 %v3805_v40, %v830_v48 }
 0x385   : > { %1044 = vst.msk [vmem:[#allocation3 + $0x18] sm:$0xff] %vm903_vm10, %v3821_v55  ;;  %859 = vperm.xlu1 %3132, %v3803_v38  }
 0x389   : > { %864 = vperm.xlu1 %3132, %v3821_v55  }
 0x38d   : > { %3134 = vrot.lane.b32.xlu1 %v3684_v47, %s3406_s22 }
 0x391   : > { %3139 = vrot.lane.b32.xlu1 %v3690_v51, %s3406_s22 }
 0x395   : > { %1045 = vrot.lane.b32.xlu1 %v3674_v42, %s3406_s22 }
 0x399   : > { %1047 = vrot.lane.b32.xlu1 %v3696_v52, %s3406_s22 }
 0x39d   : > { %1049 = vrot.lane.b32.xlu1 %v3698_v53, %s3406_s22 }
 0x3fc   : > { %v850_v60 = vpop.permute.xlu0 %849 }
 0x3fd   : > { %v867_v61 = vsub.f32 %v3756_v18, %v850_v60 }
 0x3ff   : > { %v871_v62 = vmul.f32 1.442695, %v867_v61 }
 0x400   : > { %v855_v63 = vpop.permute.xlu1 %854  ;;  %v1052_v28 = vpop.permute.xlu0 %1051 }
 0x401   : > { %3193 = vpow2.f32 %v871_v62  ;;  %v868_v0 = vsub.f32 %v3767_v20, %v855_v63 }
 0x403   : > { %v873_v1 = vmul.f32 1.442695, %v868_v0 }
 0x404   : > { %v860_v2 = vpop.permute.xlu1 %859 }
 0x405   : > { %3195 = vpow2.f32 %v873_v1  ;;  %v869_v3 = vsub.f32 %v3777_v24, %v860_v2  ;;  %v3900_v2 = vld [vmem:[#allocation3 + $0x28] sm:$0xff] }
 0x407   : > { %v875_v4 = vmul.f32 1.442695, %v869_v3  ;;  %v3902_v3 = vld [vmem:[#allocation3 + $0x20] sm:$0xff] }
 0x408   : > { %v865_v5 = vpop.permute.xlu1 %864 }
 0x409   : > { %3197 = vpow2.f32 %v875_v4  ;;  %v870_v6 = vsub.f32 %v3772_v23, %v865_v5 }
 0x40b   : > { %v3845_v7 = vpop.eup %3193  ;;  %v877_v8 = vmul.f32 1.442695, %v870_v6 }
 0x40c   : > { %2806 = vmatprep.mubr.msk.f32.mxu1 %vm701_vm4, %v3845_v7  ;;  %v3135_v11 = vpop.permute.xlu1 %3134 }
 0x40d   : > { %3199 = vpow2.f32 %v877_v8  ;;  %v3137_v12 = vunpack.i.h.bf16 %v3135_v11  ;;  %v3136_v16 = vunpack.i.l.bf16 %v3135_v11 }
 0x40f   : > { %v3849_v17 = vpop.eup %3195  ;;  %v2964_v18 = vpack.c.bf16 %v3137_v12, %v3136_v16  ;;  %v3915_v12 = vld [vmem:[#allocation3 + $0x30] sm:$0xff]  ;;  %v3917_v16 = vld [vmem:[#allocation3 + $0x38] sm:$0xff] }
 0x410   : > { %2807 = vmatmul.mubr.msk.f32.vlgmr.msra.gmra.mrb[4].mxu1 %vm701_vm4, %v3849_v17  ;;  %v3140_v19 = vpop.permute.xlu1 %3139 }
 0x411   : > { %v3142_v20 = vunpack.i.h.bf16 %v3140_v19  ;;  %v3141_v21 = vunpack.i.l.bf16 %v3140_v19  ;;  %2966 = vmatprep.subr.msk.bf16.mxu1 %vm3680_vm5, %v2964_v18 }
 0x412   : > { %2969 = vmatpush3.bf16.xpose.msk.msra.mxu1 %vm3680_vm5, %v2964_v18 }
 0x413   : > { %v3857_v22 = vpop.eup %3197  ;;  %v2970_v23 = vpack.c.bf16 %v3142_v20, %v3141_v21 }
 0x414   : > { %2809 = vmatprep.mubr.msk.f32.mxu1 %vm701_vm4, %v3857_v22  ;;  %v1046_v24 = vpop.permute.xlu1 %1045 }
 0x415   : > { %2972 = vmatprep.subr.msk.bf16.mxu1 %vm3680_vm5, %v2970_v23 }
 0x417   : > { %v3863_v25 = vpop.eup %3199 }
 0x418   : > { %2810 = vmatmul.mubr.msk.f32.gmra.mrb[6].mxu1 %vm701_vm4, %v3863_v25  ;;  %v1048_v26 = vpop.permute.xlu1 %1047 }
 0x419   : > { %2820 = vmatprep.mubr.msk.f32.mxu1 %vm701_vm4, %v1046_v24 }
 0x41a   : > { %2975 = vmatpush3.bf16.xpose.msk.msra.mxu1 %vm3680_vm5, %v2970_v23 }
 0x41c   : > { %v1050_v27 = vpop.permute.xlu1 %1049 }
 0x421   : > { %2821 = vmatmul.mubr.msk.f32.vlgmr.msra.gmra.mrb[8].mxu1 %vm701_vm4, %v1048_v26 }
 0x422   : > { %2823 = vmatprep.mubr.msk.f32.mxu1 %vm701_vm4, %v1050_v27 }
 0x425   : > { %2824 = vmatmul.mubr.msk.f32.gmra.mrb[10].mxu1 %vm701_vm4, %v1052_v28 }
 0x4e3   : > { %v3873_v30 = vpop.f32.mrb[4].mxu1 }
 0x4e4   : > { %v3875_v35 = vpop.f32.mrb[5].mxu1 }
 0x4eb   : > { %v3877_v36 = vpop.f32.mrb[6].mxu1 }
 0x4ec   : > { %v3879_v39 = vpop.f32.mrb[7].mxu1 }
 0x4ed   : > { %4483 = vst [vmem:[#allocation18_spill] sm:$0xff] %v3879_v39 }
 0x4f4   : > { %v2822_v41 = vpop.f32.mrb[8].mxu1 }
 0x4f5   : > { %v1163_v46 = vsel %vm698_vm7, %v2822_v41, -1e+30  ;;  %v1143_v48 = vpop.f32.mrb[9].mxu1 }
 0x4f6   : > { %v1162_v49 = vsel %vm697_vm6, %v1143_v48, -1e+30  ;;  %v1174_v56 = vsel %vm701_vm4, %v1163_v46, -inf }
 0x4f7   : > { %1175 = vmax.xlane.f32.xlu0 %v1174_v56  ;;  %v1171_v57 = vsel %vm701_vm4, %v1162_v49, -inf }
 0x4f8   : > { %1172 = vmax.xlane.f32.xlu1 %v1171_v57  ;;  %v2825_v60 = vpop.f32.mrb[10].mxu1 }
 0x4f9   : > { %v3892_v61 = vsel %vm700_vm8, %v2825_v60, -1e+30  ;;  %v1153_v62 = vpop.f32.mrb[11].mxu1 }
 0x4fa   : > { %v1164_v63 = vsel %vm699_vm9, %v1153_v62, -1e+30  ;;  %v1180_v0 = vsel %vm701_vm4, %v3892_v61, -inf }
 0x4fb   : > { %v1177_v1 = vsel %vm701_vm4, %v1164_v63, -inf }
 0x4fc   : > { %1178 = vmax.xlane.f32.xlu0 %v1177_v1  ;;  %1181 = vmax.xlane.f32.xlu1 %v1180_v0 }
 0x584   : > { %v1176_v4 = vpop.xlane.xlu0 %1175 }
 0x585   : > { %v3905_v5 = vmax.f32 %v3900_v2, %v1176_v4  ;;  %v1173_v6 = vpop.xlane.xlu1 %1172 }
 0x586   : > { %v3908_v8 = vmax.f32 %v3902_v3, %v1173_v6 }
 0x587   : > { %1411 = vst.msk [vmem:[#allocation3 + $0x28] sm:$0xff] %vm903_vm10, %v3905_v5  ;;  %1206 = vperm.xlu1 %3132, %v3905_v5  }
 0x588   : > { %1410 = vst.msk [vmem:[#allocation3 + $0x20] sm:$0xff] %vm903_vm10, %v3908_v8  ;;  %1201 = vperm.xlu0 %3131, %v3908_v8  }
 0x589   : > { %v1179_v19 = vpop.xlane.xlu0 %1178  ;;  %v1182_v20 = vpop.xlane.xlu1 %1181 }
 0x58a   : > { %v3925_v21 = vmax.f32 %v3915_v12, %v1179_v19  ;;  %v3928_v23 = vmax.f32 %v3917_v16, %v1182_v20 }
 0x58b   : > { %3144 = vrot.lane.b32.xlu1 %v3818_v50, %s3406_s22 }
 0x58c   : > { %1412 = vst.msk [vmem:[#allocation3 + $0x30] sm:$0xff] %vm903_vm10, %v3925_v21  ;;  %1211 = vperm.xlu0 %3131, %v3925_v21   ;;  %1413 = vst.msk [vmem:[#allocation3 + $0x38] sm:$0xff] %vm903_vm10, %v3928_v23 }
 0x58f   : > { %3149 = vrot.lane.b32.xlu1 %v3828_v59, %s3406_s22 }
 0x590   : > { %1216 = vperm.xlu0 %3131, %v3928_v23  }
 0x593   : > { %3154 = vrot.lane.b32.xlu1 %v3684_v47, %s3407_s25 }
 0x594   : > { %3159 = vrot.lane.b32.xlu0 %v3690_v51, %s3407_s25 }
 0x597   : > { %1414 = vrot.lane.b32.xlu1 %v3674_v42, %s3407_s25 }
 0x598   : > { %1416 = vrot.lane.b32.xlu0 %v3696_v52, %s3407_s25 }
 0x59b   : > { %1418 = vrot.lane.b32.xlu1 %v3698_v53, %s3407_s25 }
 0x59c   : > { %1420 = vrot.lane.b32.xlu0 %v3704_v54, %s3407_s25 }
 0x606   : > { %v1207_v27 = vpop.permute.xlu1 %1206 }
 0x607   : > { %v1220_v28 = vsub.f32 %v1163_v46, %v1207_v27  ;;  %v1202_v41 = vpop.permute.xlu0 %1201 }
 0x608   : > { %v1219_v48 = vsub.f32 %v1162_v49, %v1202_v41 }
 0x609   : > { %v1225_v56 = vmul.f32 1.442695, %v1220_v28 }
 0x60a   : > { %v1223_v57 = vmul.f32 1.442695, %v1219_v48  ;;  %v3145_v60 = vpop.permute.xlu1 %3144 }
 0x60b   : > { %v3147_v62 = vunpack.i.h.bf16 %v3145_v60  ;;  %v3146_v0 = vunpack.i.l.bf16 %v3145_v60  ;;  %v1212_v1 = vpop.permute.xlu0 %1211 }
 0x60c   : > { %3201 = vpow2.f32 %v1223_v57  ;;  %v1221_v4 = vsub.f32 %v1164_v63, %v1212_v1 }
 0x60d   : > { %3203 = vpow2.f32 %v1225_v56  ;;  %v2976_v6 = vpack.c.bf16 %v3147_v62, %v3146_v0 }
 0x60e   : > { %v1227_v19 = vmul.f32 1.442695, %v1221_v4  ;;  %v3150_v20 = vpop.permute.xlu1 %3149 }
 0x60f   : > { %v3152_v26 = vunpack.i.h.bf16 %v3150_v20  ;;  %v3151_v24 = vunpack.i.l.bf16 %v3150_v20  ;;  %2977 = vmatprep.subr.bf16.mxu0 %v2976_v6  ;;  %v1217_v18 = vpop.permute.xlu0 %1216 }
 0x610   : > { %3205 = vpow2.f32 %v1227_v19  ;;  %v1222_v46 = vsub.f32 %v3892_v61, %v1217_v18  ;;  %2979 = vmatpush3.bf16.msra.mxu0 %v2976_v6 }
 0x611   : > { %v2980_v49 = vpack.c.bf16 %v3152_v26, %v3151_v24 }
 0x612   : > { %v1229_v27 = vmul.f32 1.442695, %v1222_v46  ;;  %v3155_v28 = vpop.permute.xlu1 %3154 }
 0x613   : > { %v3157_v41 = vunpack.i.h.bf16 %v3155_v28  ;;  %v3156_v48 = vunpack.i.l.bf16 %v3155_v28  ;;  %2981 = vmatprep.subr.bf16.mxu0 %v2980_v49  ;;  %v3160_v56 = vpop.permute.xlu0 %3159 }
 0x614   : > { %3207 = vpow2.f32 %v1229_v27  ;;  %2983 = vmatpush3.bf16.msra.mxu0 %v2980_v49  ;;  %v3162_v61 = vunpack.i.h.bf16 %v3160_v56  ;;  %v3161_v18 = vunpack.i.l.bf16 %v3160_v56 }
 0x615   : > { %v2984_v63 = vpack.c.bf16 %v3157_v41, %v3156_v48 }
 0x616   : > { %v3957_v57 = vpop.eup %3201  ;;  %v2990_v26 = vpack.c.bf16 %v3162_v61, %v3161_v18  ;;  %v1415_v62 = vpop.permute.xlu1 %1414 }
 0x617   : > { %v3959_v60 = vpop.eup %3203  ;;  %2834 = vmatprep.mubr.msk.f32.mxu0 %vm701_vm4, %v3957_v57  ;;  %2986 = vmatprep.subr.msk.bf16.mxu0 %vm3680_vm5, %v2984_v63  ;;  %v1417_v1 = vpop.permute.xlu0 %1416 }
 0x618   : > { %2835 = vmatmul.mubr.msk.f32.vlgmr.msra.gmra.mrb[8].mxu0 %vm701_vm4, %v3959_v60 }
 0x61a   : > { %v3967_v24 = vpop.eup %3205  ;;  %v1419_v4 = vpop.permute.xlu1 %1418 }
 0x61b   : > { %2837 = vmatprep.mubr.msk.f32.mxu0 %vm701_vm4, %v3967_v24  ;;  %v1421_v6 = vpop.permute.xlu0 %1420 }
 0x61d   : > { %2989 = vmatpush3.bf16.xpose.msk.msra.mxu0 %vm3680_vm5, %v2984_v63 }
 0x61e   : > { %v3973_v0 = vpop.eup %3207  ;;  %2992 = vmatprep.subr.msk.bf16.mxu0 %vm3680_vm5, %v2990_v26 }
 0x61f   : > { %2838 = vmatmul.mubr.msk.f32.gmra.mrb[10].mxu0 %vm701_vm4, %v3973_v0 }
 0x620   : > { %2848 = vmatprep.mubr.msk.f32.mxu0 %vm701_vm4, %v1415_v62 }
 0x625   : > { %2995 = vmatpush3.bf16.xpose.msk.msra.mxu0 %vm3680_vm5, %v2990_v26 }
 0x62c   : > { %2849 = vmatmul.mubr.msk.f32.vlgmr.msra.gmra.mrb[12].mxu0 %vm701_vm4, %v1417_v1 }
 0x62d   : > { %2851 = vmatprep.mubr.msk.f32.mxu0 %vm701_vm4, %v1419_v4 }
 0x630   : > { %2852 = vmatmul.mubr.msk.f32.gmra.mrb[14].mxu0 %vm701_vm4, %v1421_v6  ;;  %v4012_v6 = vld [vmem:[#allocation3 + $0x48] sm:$0xff] }
 0x6eb   : > { %v3985_v19 = vpop.f32.mrb[8].mxu0 }
 0x6ec   : > { %4484 = vst [vmem:[#allocation19_spill] sm:$0xff] %v3985_v19  ;;  %v3987_v20 = vpop.f32.mrb[9].mxu0 }
 0x6ed   : > { %4485 = vst [vmem:[#allocation20_spill] sm:$0xff] %v3987_v20 }
 0x6f2   : > { %v3989_v46 = vpop.f32.mrb[10].mxu0 }
 0x6f3   : > { %4486 = vst [vmem:[#allocation21_spill] sm:$0xff] %v3989_v46  ;;  %v3991_v49 = vpop.f32.mrb[11].mxu0 }
 0x6f4   : > { %4487 = vst [vmem:[#allocation22_spill] sm:$0xff] %v3991_v49 }
 0x6ff   : > { %v2850_v27 = vpop.f32.mrb[12].mxu0 }
 0x700   : > { %v1532_v28 = vsel %vm698_vm7, %v2850_v27, -1e+30  ;;  %v1512_v41 = vpop.f32.mrb[13].mxu0  ;;  %v4014_v27 = vld [vmem:[#allocation3 + $0x40] sm:$0xff] }
 0x701   : > { %v1531_v48 = vsel %vm697_vm6, %v1512_v41, -1e+30  ;;  %v1543_v63 = vsel %vm701_vm4, %v1532_v28, -inf }
 0x702   : > { %1544 = vmax.xlane.f32.xlu0 %v1543_v63  ;;  %v1540_v56 = vsel %vm701_vm4, %v1531_v48, -inf }
 0x703   : > { %1541 = vmax.xlane.f32.xlu1 %v1540_v56  ;;  %v2853_v61 = vpop.f32.mrb[14].mxu0 }
 0x704   : > { %v4004_v18 = vsel %vm700_vm8, %v2853_v61, -1e+30  ;;  %v1522_v26 = vpop.f32.mrb[15].mxu0 }
 0x705   : > { %v1533_v62 = vsel %vm699_vm9, %v1522_v26, -1e+30  ;;  %v1549_v1 = vsel %vm701_vm4, %v4004_v18, -inf }
 0x706   : > { %v1546_v4 = vsel %vm701_vm4, %v1533_v62, -inf }
 0x707   : > { %1547 = vmax.xlane.f32.xlu0 %v1546_v4  ;;  %1550 = vmax.xlane.f32.xlu1 %v1549_v1  ;;  %v4027_v1 = vld [vmem:[#allocation3 + $0x50] sm:$0xff]  ;;  %v4029_v4 = vld [vmem:[#allocation3 + $0x58] sm:$0xff] }
 0x78f   : > { %v1545_v41 = vpop.xlane.xlu0 %1544 }
 0x790   : > { %v4017_v63 = vmax.f32 %v4012_v6, %v1545_v41  ;;  %v1542_v56 = vpop.xlane.xlu1 %1541 }
 0x791   : > { %v4020_v61 = vmax.f32 %v4014_v27, %v1542_v56 }
 0x792   : > { %1776 = vst.msk [vmem:[#allocation3 + $0x48] sm:$0xff] %vm903_vm10, %v4017_v63  ;;  %1575 = vperm.xlu1 %3132, %v4017_v63  }
 0x793   : > { %1775 = vst.msk [vmem:[#allocation3 + $0x40] sm:$0xff] %vm903_vm10, %v4020_v61  ;;  %1570 = vperm.xlu0 %3131, %v4020_v61  }
 0x794   : > { %v1548_v56 = vpop.xlane.xlu0 %1547  ;;  %v1551_v11 = vpop.xlane.xlu1 %1550 }
 0x795   : > { %v4037_v26 = vmax.f32 %v4027_v1, %v1548_v56  ;;  %v4040_v58 = vmax.f32 %v4029_v4, %v1551_v11 }
 0x796   : > { %3164 = vrot.lane.b32.xlu1 %v3818_v50, %s3407_s25 }
 0x797   : > { %1777 = vst.msk [vmem:[#allocation3 + $0x50] sm:$0xff] %vm903_vm10, %v4037_v26  ;;  %1580 = vperm.xlu0 %3131, %v4037_v26   ;;  %1778 = vst.msk [vmem:[#allocation3 + $0x58] sm:$0xff] %vm903_vm10, %v4040_v58 }
 0x79a   : > { %3169 = vrot.lane.b32.xlu1 %v3828_v59, %s3407_s25 }
 0x79b   : > { %1585 = vperm.xlu0 %3131, %v4040_v58  }
 0x79e   : > { %3174 = vrot.lane.b32.xlu1 %v3684_v47, %s3408_s7 }
 0x79f   : > { %3179 = vrot.lane.b32.xlu0 %v3690_v51, %s3408_s7 }
 0x7a2   : > { %1779 = vrot.lane.b32.xlu1 %v3674_v42, %s3408_s7 }
 0x7a3   : > { %1781 = vrot.lane.b32.xlu0 %v3696_v52, %s3408_s7 }
 0x7a6   : > { %1783 = vrot.lane.b32.xlu1 %v3698_v53, %s3408_s7 }
 0x7a7   : > { %1785 = vrot.lane.b32.xlu0 %v3704_v54, %s3408_s7 }
 0x811   : > { %v1576_v11 = vpop.permute.xlu1 %1575 }
 0x812   : > { %v1589_v56 = vsub.f32 %v1532_v28, %v1576_v11  ;;  %v1571_v41 = vpop.permute.xlu0 %1570 }
 0x813   : > { %v1588_v44 = vsub.f32 %v1531_v48, %v1571_v41 }
 0x814   : > { %v1594_v47 = vmul.f32 1.442695, %v1589_v56 }
 0x815   : > { %v1592_v43 = vmul.f32 1.442695, %v1588_v44  ;;  %v3165_v34 = vpop.permute.xlu1 %3164 }
 0x816   : > { %v3167_v51 = vunpack.i.h.bf16 %v3165_v34  ;;  %v3166_v49 = vunpack.i.l.bf16 %v3165_v34  ;;  %v1581_v46 = vpop.permute.xlu0 %1580 }
 0x817   : > { %3209 = vpow2.f32 %v1592_v43  ;;  %v1590_v42 = vsub.f32 %v1533_v62, %v1581_v46 }
 0x818   : > { %3211 = vpow2.f32 %v1594_v47  ;;  %v2996_v52 = vpack.c.bf16 %v3167_v51, %v3166_v49 }
 0x819   : > { %v1596_v19 = vmul.f32 1.442695, %v1590_v42  ;;  %v3170_v20 = vpop.permute.xlu1 %3169 }
 0x81a   : > { %v3172_v53 = vunpack.i.h.bf16 %v3170_v20  ;;  %v3171_v39 = vunpack.i.l.bf16 %v3170_v20  ;;  %2997 = vmatprep.subr.bf16.mxu1 %v2996_v52  ;;  %v1586_v54 = vpop.permute.xlu0 %1585 }
 0x81b   : > { %3213 = vpow2.f32 %v1596_v19  ;;  %v1591_v28 = vsub.f32 %v4004_v18, %v1586_v54  ;;  %2999 = vmatpush3.bf16.msra.mxu1 %v2996_v52 }
 0x81c   : > { %v3000_v48 = vpack.c.bf16 %v3172_v53, %v3171_v39 }
 0x81d   : > { %v1598_v44 = vmul.f32 1.442695, %v1591_v28  ;;  %v3175_v41 = vpop.permute.xlu1 %3174 }
 0x81e   : > { %v3177_v11 = vunpack.i.h.bf16 %v3175_v41  ;;  %v3176_v34 = vunpack.i.l.bf16 %v3175_v41  ;;  %3001 = vmatprep.subr.bf16.mxu1 %v3000_v48  ;;  %v3180_v46 = vpop.permute.xlu0 %3179 }
 0x81f   : > { %3215 = vpow2.f32 %v1598_v44  ;;  %3003 = vmatpush3.bf16.msra.mxu1 %v3000_v48  ;;  %v3182_v39 = vunpack.i.h.bf16 %v3180_v46  ;;  %v3181_v19 = vunpack.i.l.bf16 %v3180_v46 }
 0x820   : > { %v3004_v43 = vpack.c.bf16 %v3177_v11, %v3176_v34 }
 0x821   : > { %v4069_v49 = vpop.eup %3209  ;;  %v3010_v18 = vpack.c.bf16 %v3182_v39, %v3181_v19  ;;  %v1780_v56 = vpop.permute.xlu1 %1779 }
 0x822   : > { %v4071_v62 = vpop.eup %3211  ;;  %2862 = vmatprep.mubr.msk.f32.mxu1 %vm701_vm4, %v4069_v49  ;;  %3006 = vmatprep.subr.msk.bf16.mxu1 %vm3680_vm5, %v3004_v43  ;;  %v1782_v51 = vpop.permute.xlu0 %1781 }
 0x823   : > { %2863 = vmatmul.mubr.msk.f32.vlgmr.msra.gmra.mrb[12].mxu1 %vm701_vm4, %v4071_v62 }
 0x825   : > { %v4079_v20 = vpop.eup %3213  ;;  %v1784_v42 = vpop.permute.xlu1 %1783 }
 0x826   : > { %2865 = vmatprep.mubr.msk.f32.mxu1 %vm701_vm4, %v4079_v20  ;;  %v1786_v52 = vpop.permute.xlu0 %1785 }
 0x828   : > { %3009 = vmatpush3.bf16.xpose.msk.msra.mxu1 %vm3680_vm5, %v3004_v43 }
 0x829   : > { %v4085_v47 = vpop.eup %3215  ;;  %3012 = vmatprep.subr.msk.bf16.mxu1 %vm3680_vm5, %v3010_v18 }
 0x82a   : > { %2866 = vmatmul.mubr.msk.f32.gmra.mrb[14].mxu1 %vm701_vm4, %v4085_v47 }
 0x82b   : > { %2876 = vmatprep.mubr.msk.f32.mxu1 %vm701_vm4, %v1780_v56  ;;  %v4133_v56 = vld [vmem:[#allocation3 + $0x68] sm:$0xff] }
 0x830   : > { %3015 = vmatpush3.bf16.xpose.msk.msra.mxu1 %vm3680_vm5, %v3010_v18 }
 0x837   : > { %2877 = vmatmul.mubr.msk.f32.vlgmr.msra.gmra.mrb[16].mxu1 %vm701_vm4, %v1782_v51  ;;  %v4135_v51 = vld [vmem:[#allocation3 + $0x60] sm:$0xff] }
 0x838   : > { %2879 = vmatprep.mubr.msk.f32.mxu1 %vm701_vm4, %v1784_v42 }
 0x83b   : > { %2880 = vmatmul.mubr.msk.f32.gmra.mrb[18].mxu1 %vm701_vm4, %v1786_v52 }
 0x8f6   : > { %v4097_v53 = vpop.f32.mrb[12].mxu1 }
 0x8f7   : > { %v4099_v54 = vpop.f32.mrb[13].mxu1 }
 0x8fd   : > { %v4101_v28 = vpop.f32.mrb[14].mxu1 }
 0x8fe   : > { %v4103_v48 = vpop.f32.mrb[15].mxu1 }
 0x90a   : > { %v2878_v44 = vpop.f32.mrb[16].mxu1 }
 0x90b   : > { %v4108_v45 = vsel %vm698_vm7, %v2878_v44, -1e+30  ;;  %v1877_v41 = vpop.f32.mrb[17].mxu1  ;;  %v4148_v44 = vld [vmem:[#allocation3 + $0x78] sm:$0xff] }
 0x90c   : > { %v4113_v11 = vsel %vm697_vm6, %v1877_v41, -1e+30  ;;  %v1908_v34 = vsel %vm701_vm4, %v4108_v45, -inf  ;;  %v4150_v41 = vld [vmem:[#allocation3 + $0x70] sm:$0xff] }
 0x90d   : > { %1909 = vmax.xlane.f32.xlu0 %v1908_v34  ;;  %v1905_v43 = vsel %vm701_vm4, %v4113_v11, -inf }
 0x90e   : > { %1906 = vmax.xlane.f32.xlu1 %v1905_v43  ;;  %v2881_v46 = vpop.f32.mrb[18].mxu1 }
 0x90f   : > { %v4122_v13 = vsel %vm700_vm8, %v2881_v46, -1e+30  ;;  %v1887_v39 = vpop.f32.mrb[19].mxu1 }
 0x910   : > { %v4127_v10 = vsel %vm699_vm9, %v1887_v39, -1e+30  ;;  %v1914_v19 = vsel %vm701_vm4, %v4122_v13, -inf }
 0x911   : > { %v1911_v18 = vsel %vm701_vm4, %v4127_v10, -inf }
 0x912   : > { %1915 = vmax.xlane.f32.xlu1 %v1914_v19  ;;  %1912 = vmax.xlane.f32.xlu0 %v1911_v18 }
 0x99a   : > { %v1910_v14 = vpop.xlane.xlu0 %1909 }
 0x99b   : > { %v4138_v42 = vmax.f32 %v4133_v56, %v1910_v14  ;;  %v1907_v52 = vpop.xlane.xlu1 %1906  ;;  %v1243_v14 = vsel %vm701_vm4, %v3959_v60, 0.0  ;;  %v1609_v60 = vsel %vm701_vm4, %v4069_v49, 0.0  ;;  %v4491_v49 = vsub.f32 %v3805_v40, %v3821_v55 }
 0x99c   : > { %v4141_v9 = vmax.f32 %v4135_v51, %v1907_v52  ;;  %v890_v52 = vsel %vm701_vm4, %v3849_v17, 0.0  ;;  %v1240_v17 = vsel %vm701_vm4, %v3957_v57, 0.0  ;;  %v1618_v57 = vsel %vm701_vm4, %v4085_v47, 0.0 }
 0x99d   : > { %v1922_v15 = vsub.f32 %v4133_v56, %v4138_v42  ;;  %2141 = vst.msk [vmem:[#allocation3 + $0x68] sm:$0xff] %vm903_vm10, %v4138_v42  ;;  %1940 = vperm.xlu1 %3132, %v4138_v42   ;;  %v4492_v47 = vsub.f32 %v3900_v2, %v3905_v5  ;;  %v4496_v2 = vsub.f32 %v4012_v6, %v4017_v63 }
 0x99e   : > { %v1921_v34 = vsub.f32 %v4135_v51, %v4141_v9  ;;  %2140 = vst.msk [vmem:[#allocation3 + $0x60] sm:$0xff] %vm903_vm10, %v4141_v9  ;;  %1935 = vperm.xlu0 %3131, %v4141_v9   ;;  %v4497_v5 = vsub.f32 %v4014_v27, %v4020_v61  ;;  %v4499_v27 = vsub.f32 %v4029_v4, %v4040_v58 }
 0x99f   : > { %v1916_v43 = vpop.xlane.xlu1 %1915  ;;  %v1913_v46 = vpop.xlane.xlu0 %1912 }
 0x9a0   : > { %v4158_v39 = vmax.f32 %v4148_v44, %v1916_v43  ;;  %v4161_v19 = vmax.f32 %v4150_v41, %v1913_v46  ;;  %v893_v43 = vsel %vm701_vm4, %v3857_v22, 0.0  ;;  %v887_v46 = vsel %vm701_vm4, %v3845_v7, 0.0 }
 0x9a1   : > { %v1612_v7 = vsel %vm701_vm4, %v4071_v62, 0.0  ;;  %v1249_v22 = vsel %vm701_vm4, %v3973_v0, 0.0  ;;  %v4489_v0 = vsub.f32 %v3790_v32, %v3800_v37  ;;  %v1566_v61 = vmul.f32 1.442695, %v4499_v27 }
 0x9a2   : > { %v1924_v18 = vsub.f32 %v4148_v44, %v4158_v39  ;;  %2143 = vst.msk [vmem:[#allocation3 + $0x78] sm:$0xff] %vm903_vm10, %v4158_v39  ;;  %2142 = vst.msk [vmem:[#allocation3 + $0x70] sm:$0xff] %vm903_vm10, %v4161_v19  ;;  %1950 = vperm.xlu0 %3131, %v4158_v39   ;;  %1945 = vperm.xlu1 %3132, %v4161_v19   ;;  %v1925_v58 = vmul.f32 1.442695, %v1921_v34 }
 0x9a4   : > { %v1931_v56 = vmul.f32 1.442695, %v1924_v18 }
 0x9a6   : > { %3189 = vrot.lane.b32.xlu0 %v3828_v59, %s3408_s7  ;;  %3184 = vrot.lane.b32.xlu1 %v3818_v50, %s3408_s7  ;;  %v896_v59 = vsel %vm701_vm4, %v3863_v25, 0.0  ;;  %v1246_v50 = vsel %vm701_vm4, %v3967_v24, 0.0  ;;  %v1615_v25 = vsel %vm701_vm4, %v4079_v20, 0.0  ;;  %v4488_v24 = vsub.f32 %v3785_v29, %v3788_v31 }
 0x9a7   : > { %v4490_v20 = vsub.f32 %v3792_v33, %v3803_v38  ;;  %v1193_v29 = vmul.f32 1.442695, %v4492_v47  ;;  %v4493_v31 = vsub.f32 %v3902_v3, %v3908_v8  ;;  %v4494_v33 = vsub.f32 %v3915_v12, %v3925_v21 }
 0x9a8   : > { %v839_v62 = vmul.f32 1.442695, %v4488_v24  ;;  %v4495_v38 = vsub.f32 %v3917_v16, %v3928_v23  ;;  %v1562_v3 = vmul.f32 1.442695, %v4496_v2  ;;  %v1560_v8 = vmul.f32 1.442695, %v4497_v5 }
 0x9a9   : > { %v1191_v32 = vmul.f32 1.442695, %v4493_v31  ;;  %v1195_v37 = vmul.f32 1.442695, %v4494_v33  ;;  %v4498_v21 = vsub.f32 %v4027_v1, %v4037_v26  ;;  %v1927_v26 = vmul.f32 1.442695, %v1922_v15 }
 0x9aa   : > { %3217 = vpow2.f32 %v839_v62  ;;  %v1197_v40 = vmul.f32 1.442695, %v4495_v38  ;;  %v880_v5 = vld [vmem:[#allocation4 + $0x8] sm:$0xff] }
 0x9ab   : > { %v1564_v23 = vmul.f32 1.442695, %v4498_v21 }
 0x9b4   : > { %v4225_v55 = vpop.eup %3217 }
 0x9c5   : > { %891 = vadd.xlane.f32.xlu0 %v890_v52  ;;  %v843_v52 = vmul.f32 1.442695, %v4490_v20 }
 0x9c9   : > { %894 = vadd.xlane.f32.xlu0 %v893_v43  ;;  %v845_v43 = vmul.f32 1.442695, %v4491_v49 }
 0x9ca   : > { %888 = vadd.xlane.f32.xlu1 %v887_v46 }
 0x9cd   : > { %1244 = vadd.xlane.f32.xlu0 %v1243_v14  ;;  %v841_v14 = vmul.f32 1.442695, %v4489_v0 }
 0x9ce   : > { %897 = vadd.xlane.f32.xlu1 %v896_v59 }
 0x9cf   : > { %3219 = vpow2.f32 %v841_v14 }
 0x9d0   : > { %3221 = vpow2.f32 %v843_v52 }
 0x9d1   : > { %1247 = vadd.xlane.f32.xlu0 %v1246_v50  ;;  %3223 = vpow2.f32 %v845_v43 }
 0x9d2   : > { %1241 = vadd.xlane.f32.xlu1 %v1240_v17  ;;  %3225 = vpow2.f32 %v1193_v29 }
 0x9d3   : > { %3227 = vpow2.f32 %v1191_v32 }
 0x9d4   : > { %3229 = vpow2.f32 %v1195_v37 }
 0x9d5   : > { %1613 = vadd.xlane.f32.xlu0 %v1612_v7  ;;  %3231 = vpow2.f32 %v1197_v40  ;;  %v4500_v40 = vsub.f32 %v4150_v41, %v4161_v19  ;;  %v1233_v19 = vld [vmem:[#allocation4 + $0x28] sm:$0xff] }
 0x9d6   : > { %1250 = vadd.xlane.f32.xlu1 %v1249_v22  ;;  %3233 = vpow2.f32 %v1562_v3 }
 0x9d7   : > { %3235 = vpow2.f32 %v1560_v8  ;;  %v1929_v2 = vmul.f32 1.442695, %v4500_v40  ;;  %v908_v40 = vld [vmem:[#allocation5] sm:$0xff] }
 0x9d8   : > { %3237 = vpow2.f32 %v1564_v23  ;;  %v881_v23 = vld [vmem:[#allocation4 + $0x10] sm:$0xff] }
 0x9d9   : > { %1616 = vadd.xlane.f32.xlu0 %v1615_v25  ;;  %v4227_v46 = vpop.eup %3219  ;;  %3239 = vpow2.f32 %v1566_v61  ;;  %v879_v61 = vld [vmem:[#allocation4] sm:$0xff] }
 0x9da   : > { %1610 = vadd.xlane.f32.xlu1 %v1609_v60  ;;  %v4237_v12 = vpop.eup %3221  ;;  %3241 = vpow2.f32 %v1927_v26  ;;  %v884_v8 = vmul.f32 %v4227_v46, %v880_v5  ;;  %v883_v41 = vmul.f32 %v4225_v55, %v879_v61 }
 0x9db   : > { %v4239_v16 = vpop.eup %3223  ;;  %3243 = vpow2.f32 %v1925_v58  ;;  %v885_v26 = vmul.f32 %v4237_v12, %v881_v23 }
 0x9dc   : > { %v4246_v6 = vpop.eup %3225  ;;  %3245 = vpow2.f32 %v1931_v56 }
 0x9dd   : > { %v4248_v63 = vpop.eup %3227 }
 0x9de   : > { %1619 = vadd.xlane.f32.xlu1 %v1618_v57  ;;  %v4255_v59 = vpop.eup %3229 }
 0x9df   : > { %v4257_v50 = vpop.eup %3231 }
 0x9e0   : > { %v4264_v1 = vpop.eup %3233 }
 0x9e1   : > { %v4266_v17 = vpop.eup %3235 }
 0x9e2   : > { %v4273_v4 = vpop.eup %3237 }
 0x9e3   : > { %v4279_v42 = vpop.eup %3239 }
 0x9e4   : > { %v4282_v15 = vpop.eup %3241 }
 0x9e5   : > { %v4285_v51 = vpop.eup %3243 }
 0x9e6   : > { %v4288_v9 = vpop.eup %3245 }
 0x9ef   : > { %914 = vperm.xlu0 %3131, %v4225_v55   ;;  %919 = vperm.xlu1 %3132, %v4227_v46   ;;  %v1237_v46 = vmul.f32 %v4246_v6, %v1233_v19  ;;  %v1261_v19 = vld [vmem:[#allocation5 + $0x20] sm:$0xff] }
 0x9f3   : > { %929 = vperm.xlu0 %3131, %v4239_v16   ;;  %924 = vperm.xlu1 %3132, %v4237_v12  }
 0x9f7   : > { %1267 = vperm.xlu0 %3131, %v4248_v63   ;;  %1272 = vperm.xlu1 %3132, %v4246_v6   ;;  %v1602_v6 = vld [vmem:[#allocation4 + $0x48] sm:$0xff] }
 0x9fb   : > { %1282 = vperm.xlu0 %3131, %v4257_v50   ;;  %1277 = vperm.xlu1 %3132, %v4255_v59  }
 0x9ff   : > { %1636 = vperm.xlu0 %3131, %v4266_v17   ;;  %1641 = vperm.xlu1 %3132, %v4264_v1  }
 0xa03   : > { %1646 = vperm.xlu0 %3131, %v4273_v4  }
 0xa07   : > { %1651 = vperm.xlu0 %3131, %v4279_v42  }
 0xa0b   : > { %2006 = vperm.xlu0 %3131, %v4282_v15  }
 0xa0f   : > { %2001 = vperm.xlu0 %3131, %v4285_v51  }
 0xa13   : > { %2016 = vperm.xlu0 %3131, %v4288_v9  }
 0xa1c   : > { %v1941_v34 = vpop.permute.xlu1 %1940 }
 0xa1d   : > { %v1954_v44 = vsub.f32 %v4108_v45, %v1941_v34  ;;  %v1936_v39 = vpop.permute.xlu0 %1935 }
 0xa1e   : > { %v1953_v18 = vsub.f32 %v4113_v11, %v1936_v39 }
 0xa1f   : > { %v1959_v7 = vmul.f32 1.442695, %v1954_v44  ;;  %v882_v44 = vld [vmem:[#allocation4 + $0x18] sm:$0xff] }
 0xa20   : > { %v1957_v22 = vmul.f32 1.442695, %v1953_v18 }
 0xa21   : > { %3247 = vpow2.f32 %v1959_v7  ;;  %v1946_v25 = vpop.permute.xlu1 %1945  ;;  %v1951_v60 = vpop.permute.xlu0 %1950  ;;  %v886_v7 = vmul.f32 %v4239_v16, %v882_v44  ;;  %v1606_v16 = vmul.f32 %v4264_v1, %v1602_v6  ;;  %v4501_v44 = vld [vmem:[#allocation18_spill] sm:$0xff] }
 0xa22   : > { %3249 = vpow2.f32 %v1957_v22  ;;  %v1955_v57 = vsub.f32 %v4127_v10, %v1946_v25  ;;  %v1956_v24 = vsub.f32 %v4122_v13, %v1951_v60  ;;  %v1234_v22 = vld [vmem:[#allocation4 + $0x30] sm:$0xff]  ;;  %v1232_v60 = vld [vmem:[#allocation4 + $0x20] sm:$0xff] }
 0xa23   : > { %v1238_v55 = vmul.f32 %v4255_v59, %v1234_v22  ;;  %v1603_v59 = vld [vmem:[#allocation4 + $0x50] sm:$0xff]  ;;  %v1630_v6 = vld [vmem:[#allocation5 + $0x40] sm:$0xff] }
 0xa24   : > { %v1961_v62 = vmul.f32 1.442695, %v1955_v57  ;;  %v1963_v0 = vmul.f32 1.442695, %v1956_v24  ;;  %v4502_v22 = vld [vmem:[#allocation20_spill] sm:$0xff] }
 0xa25   : > { %v3185_v14 = vpop.permute.xlu1 %3184  ;;  %v3190_v20 = vpop.permute.xlu0 %3189 }
 0xa26   : > { %v3187_v52 = vunpack.i.h.bf16 %v3185_v14  ;;  %v3186_v49 = vunpack.i.l.bf16 %v3185_v14  ;;  %v3192_v45 = vunpack.i.h.bf16 %v3190_v20  ;;  %3251 = vpow2.f32 %v1963_v0 }
 0xa27   : > { %v3191_v43 = vunpack.i.l.bf16 %v3190_v20  ;;  %3253 = vpow2.f32 %v1961_v62  ;;  %v1236_v62 = vmul.f32 %v4248_v63, %v1232_v60  ;;  %v1235_v20 = vld [vmem:[#allocation4 + $0x38] sm:$0xff]  ;;  %v1607_v63 = vmul.f32 %v4273_v4, %v1603_v59  ;;  %v4503_v60 = vld [vmem:[#allocation19_spill] sm:$0xff] }
 0xa28   : > { %v3016_v11 = vpack.c.bf16 %v3187_v52, %v3186_v49  ;;  %3255 = vpow2.f32 %v1929_v2  ;;  %v909_v2 = vld [vmem:[#allocation5 + $0x8] sm:$0xff] }
 0xa29   : > { %v3020_v47 = vpack.c.bf16 %v3192_v45, %v3191_v43  ;;  %v1239_v45 = vmul.f32 %v4257_v50, %v1235_v20  ;;  %v1631_v20 = vld [vmem:[#allocation5 + $0x48] sm:$0xff] }
 0xa2a   : > { %3017 = vmatprep.subr.bf16.mxu0 %v3016_v11 }
 0xa2b   : > { %v3248_v29 = vpop.eup %3247  ;;  %3019 = vmatpush3.bf16.msra.mxu0 %v3016_v11 }
 0xa2c   : > { %v3250_v31 = vpop.eup %3249  ;;  %3021 = vmatprep.subr.bf16.mxu0 %v3020_v47  ;;  %v1977_v10 = vsel %vm701_vm4, %v3248_v29, 0.0 }
 0xa2d   : > { %1978 = vadd.xlane.f32.xlu1 %v1977_v10  ;;  %2890 = vmatprep.mubr.msk.f32.mxu0 %vm701_vm4, %v3250_v31  ;;  %v1974_v13 = vsel %vm701_vm4, %v3250_v31, 0.0 }
 0xa2f   : > { %3023 = vmatpush3.bf16.msra.mxu0 %v3020_v47  ;;  %v1601_v47 = vld [vmem:[#allocation4 + $0x40] sm:$0xff] }
 0xa30   : > { %v3252_v32 = vpop.eup %3251  ;;  %v1605_v10 = vmul.f32 %v4266_v17, %v1601_v47 }
 0xa31   : > { %1975 = vadd.xlane.f32.xlu1 %v1974_v13  ;;  %v3254_v33 = vpop.eup %3253  ;;  %v1983_v37 = vsel %vm701_vm4, %v3252_v32, 0.0 }
 0xa32   : > { %2891 = vmatmul.mubr.msk.f32.vlgmr.msra.gmra.mrb[16].mxu0 %vm701_vm4, %v3248_v29  ;;  %v1980_v38 = vsel %vm701_vm4, %v3254_v33, 0.0  ;;  %v4306_v3 = vpop.eup %3255 }
 0xa33   : > { %2893 = vmatprep.mubr.msk.f32.mxu0 %vm701_vm4, %v3254_v33 }
 0xa35   : > { %1984 = vadd.xlane.f32.xlu1 %v1983_v37 }
 0xa36   : > { %2894 = vmatmul.mubr.msk.f32.gmra.mrb[18].mxu0 %vm701_vm4, %v3252_v32  ;;  %v1604_v32 = vld [vmem:[#allocation4 + $0x58] sm:$0xff] }
 0xa37   : > { %v1608_v50 = vmul.f32 %v4279_v42, %v1604_v32 }
 0xa39   : > { %1981 = vadd.xlane.f32.xlu1 %v1980_v38 }
 0xa4a   : > { %2011 = vperm.xlu1 %3132, %v4306_v3  }
 0xa52   : > { %v892_v21 = vpop.xlane.xlu0 %891 }
 0xa53   : > { %v900_v27 = vadd.f32 %v892_v21, %v884_v8  ;;  %v911_v21 = vld [vmem:[#allocation5 + $0x18] sm:$0xff] }
 0xa55   : > { %905 = vst.msk [vmem:[#allocation4 + $0x8] sm:$0xff] %vm903_vm10, %v900_v27  ;;  %v910_v27 = vld [vmem:[#allocation5 + $0x10] sm:$0xff] }
 0xa56   : > { %v895_v58 = vpop.xlane.xlu0 %894 }
 0xa57   : > { %v901_v56 = vadd.f32 %v895_v58, %v885_v26  ;;  %v889_v34 = vpop.xlane.xlu1 %888 }
 0xa58   : > { %v899_v39 = vadd.f32 %v889_v34, %v883_v41  ;;  %v1262_v34 = vld [vmem:[#allocation5 + $0x28] sm:$0xff] }
 0xa59   : > { %906 = vst.msk [vmem:[#allocation4 + $0x10] sm:$0xff] %vm903_vm10, %v901_v56 }
 0xa5a   : > { %904 = vst.msk [vmem:[#allocation4] sm:$0xff] %vm903_vm10, %v899_v39  ;;  %v1245_v18 = vpop.xlane.xlu0 %1244 }
 0xa5b   : > { %v1253_v25 = vadd.f32 %v1245_v18, %v1237_v46  ;;  %v898_v12 = vpop.xlane.xlu1 %897 }
 0xa5c   : > { %v902_v57 = vadd.f32 %v898_v12, %v886_v7  ;;  %v1264_v7 = vld [vmem:[#allocation5 + $0x38] sm:$0xff]  ;;  %v1263_v12 = vld [vmem:[#allocation5 + $0x30] sm:$0xff] }
 0xa5d   : > { %1257 = vst.msk [vmem:[#allocation4 + $0x28] sm:$0xff] %vm903_vm10, %v1253_v25 }
 0xa5e   : > { %907 = vst.msk [vmem:[#allocation4 + $0x18] sm:$0xff] %vm903_vm10, %v902_v57  ;;  %v1248_v24 = vpop.xlane.xlu0 %1247 }
 0xa5f   : > { %v1254_v0 = vadd.f32 %v1248_v24, %v1238_v55  ;;  %v1242_v14 = vpop.xlane.xlu1 %1241 }
 0xa60   : > { %v1252_v52 = vadd.f32 %v1242_v14, %v1236_v62 }
 0xa61   : > { %1258 = vst.msk [vmem:[#allocation4 + $0x30] sm:$0xff] %vm903_vm10, %v1254_v0  ;;  %v4504_v0 = vld [vmem:[#allocation21_spill] sm:$0xff] }
 0xa62   : > { %1256 = vst.msk [vmem:[#allocation4 + $0x20] sm:$0xff] %vm903_vm10, %v1252_v52  ;;  %v1614_v49 = vpop.xlane.xlu0 %1613  ;;  %v4505_v52 = vld [vmem:[#allocation22_spill] sm:$0xff] }
 0xa63   : > { %v1622_v43 = vadd.f32 %v1614_v49, %v1606_v16  ;;  %v1251_v11 = vpop.xlane.xlu1 %1250 }
 0xa64   : > { %v1255_v29 = vadd.f32 %v1251_v11, %v1239_v45  ;;  %v1632_v11 = vld [vmem:[#allocation5 + $0x50] sm:$0xff] }
 0xa65   : > { %1626 = vst.msk [vmem:[#allocation4 + $0x48] sm:$0xff] %vm903_vm10, %v1622_v43 }
 0xa66   : > { %1259 = vst.msk [vmem:[#allocation4 + $0x38] sm:$0xff] %vm903_vm10, %v1255_v29  ;;  %v1617_v31 = vpop.xlane.xlu0 %1616 }
 0xa67   : > { %v1623_v1 = vadd.f32 %v1617_v31, %v1607_v63  ;;  %v1611_v13 = vpop.xlane.xlu1 %1610 }
 0xa68   : > { %v1621_v33 = vadd.f32 %v1611_v13, %v1605_v10  ;;  %v1633_v10 = vld [vmem:[#allocation5 + $0x58] sm:$0xff] }
 0xa69   : > { %1627 = vst.msk [vmem:[#allocation4 + $0x50] sm:$0xff] %vm903_vm10, %v1623_v1 }
 0xa6a   : > { %1625 = vst.msk [vmem:[#allocation4 + $0x40] sm:$0xff] %vm903_vm10, %v1621_v33 }
 0xa6b   : > { %v1620_v37 = vpop.xlane.xlu1 %1619 }
 0xa6c   : > { %v1624_v38 = vadd.f32 %v1620_v37, %v1608_v50  ;;  %v1966_v37 = vld [vmem:[#allocation4 + $0x60] sm:$0xff] }
 0xa6e   : > { %1628 = vst.msk [vmem:[#allocation4 + $0x58] sm:$0xff] %vm903_vm10, %v1624_v38  ;;  %v915_v4 = vpop.permute.xlu0 %914 }
 0xa6f   : > { %v932_v5 = vmul.f32 %v915_v4, %v908_v40  ;;  %v920_v8 = vpop.permute.xlu1 %919  ;;  %v1970_v40 = vmul.f32 %v4285_v51, %v1966_v37 }
 0xa70   : > { %v933_v17 = vmul.f32 %v920_v8, %v909_v2  ;;  %v1968_v8 = vld [vmem:[#allocation4 + $0x70] sm:$0xff] }
 0xa71   : > { %v1033_v23 = vadd.f32 %v3875_v35, %v932_v5 }
 0xa72   : > { %v1034_v61 = vadd.f32 %v3873_v30, %v933_v17  ;;  %v930_v26 = vpop.permute.xlu0 %929 }
 0xa73   : > { %1037 = vst.msk [vmem:[#allocation5] sm:$0xff] %vm701_vm4, %v1033_v23  ;;  %v935_v42 = vmul.f32 %v930_v26, %v911_v21  ;;  %v925_v58 = vpop.permute.xlu1 %924  ;;  %v1995_v26 = vld [vmem:[#allocation5 + $0x60] sm:$0xff] }
 0xa74   : > { %1038 = vst.msk [vmem:[#allocation5 + $0x8] sm:$0xff] %vm701_vm4, %v1034_v61  ;;  %v934_v41 = vmul.f32 %v925_v58, %v910_v27  ;;  %v1996_v61 = vld [vmem:[#allocation5 + $0x68] sm:$0xff] }
 0xa75   : > { %v1036_v56 = vadd.f32 %v3877_v36, %v935_v42 }
 0xa76   : > { %v1035_v39 = vadd.f32 %v4501_v44, %v934_v41  ;;  %v1268_v46 = vpop.permute.xlu0 %1267  ;;  %v1998_v41 = vld [vmem:[#allocation5 + $0x78] sm:$0xff] }
 0xa77   : > { %1040 = vst.msk [vmem:[#allocation5 + $0x18] sm:$0xff] %vm701_vm4, %v1036_v56  ;;  %v1285_v35 = vmul.f32 %v1268_v46, %v1261_v19  ;;  %v1273_v18 = vpop.permute.xlu1 %1272  ;;  %v1997_v56 = vld [vmem:[#allocation5 + $0x70] sm:$0xff] }
 0xa78   : > { %1039 = vst.msk [vmem:[#allocation5 + $0x10] sm:$0xff] %vm701_vm4, %v1035_v39  ;;  %v1286_v30 = vmul.f32 %v1273_v18, %v1262_v34 }
 0xa79   : > { %v1402_v25 = vadd.f32 %v4502_v22, %v1285_v35 }
 0xa7a   : > { %v1403_v57 = vadd.f32 %v4503_v60, %v1286_v30  ;;  %v1283_v55 = vpop.permute.xlu0 %1282 }
 0xa7b   : > { %1406 = vst.msk [vmem:[#allocation5 + $0x20] sm:$0xff] %vm701_vm4, %v1402_v25  ;;  %v1288_v36 = vmul.f32 %v1283_v55, %v1264_v7  ;;  %v1278_v24 = vpop.permute.xlu1 %1277 }
 0xa7c   : > { %1407 = vst.msk [vmem:[#allocation5 + $0x28] sm:$0xff] %vm701_vm4, %v1403_v57  ;;  %v1287_v62 = vmul.f32 %v1278_v24, %v1263_v12 }
 0xa7d   : > { %v1405_v14 = vadd.f32 %v4504_v0, %v1288_v36 }
 0xa7e   : > { %v1404_v16 = vadd.f32 %v4505_v52, %v1287_v62  ;;  %v1637_v49 = vpop.permute.xlu0 %1636 }
 0xa7f   : > { %1409 = vst.msk [vmem:[#allocation5 + $0x38] sm:$0xff] %vm701_vm4, %v1405_v14  ;;  %v1654_v45 = vmul.f32 %v1637_v49, %v1630_v6  ;;  %v1642_v59 = vpop.permute.xlu1 %1641 }
 0xa80   : > { %1408 = vst.msk [vmem:[#allocation5 + $0x30] sm:$0xff] %vm701_vm4, %v1404_v16  ;;  %v1655_v43 = vmul.f32 %v1642_v59, %v1631_v20 }
 0xa81   : > { %v1767_v47 = vadd.f32 %v4099_v54, %v1654_v45  ;;  %v1967_v54 = vld [vmem:[#allocation4 + $0x68] sm:$0xff] }
 0xa82   : > { %v1768_v29 = vadd.f32 %v4097_v53, %v1655_v43  ;;  %v1647_v63 = vpop.permute.xlu0 %1646  ;;  %v1971_v53 = vmul.f32 %v4282_v15, %v1967_v54  ;;  %v1972_v15 = vmul.f32 %v4306_v3, %v1968_v8 }
 0xa83   : > { %1771 = vst.msk [vmem:[#allocation5 + $0x40] sm:$0xff] %vm701_vm4, %v1767_v47  ;;  %v1656_v31 = vmul.f32 %v1647_v63, %v1632_v11 }
 0xa84   : > { %1772 = vst.msk [vmem:[#allocation5 + $0x48] sm:$0xff] %vm701_vm4, %v1768_v29 }
 0xa85   : > { %v1769_v1 = vadd.f32 %v4103_v48, %v1656_v31  ;;  %v1969_v48 = vld [vmem:[#allocation4 + $0x78] sm:$0xff] }
 0xa86   : > { %v1652_v13 = vpop.permute.xlu0 %1651  ;;  %v1973_v5 = vmul.f32 %v4288_v9, %v1969_v48 }
 0xa87   : > { %1773 = vst.msk [vmem:[#allocation5 + $0x50] sm:$0xff] %vm701_vm4, %v1769_v1  ;;  %v1657_v32 = vmul.f32 %v1652_v13, %v1633_v10 }
 0xa89   : > { %v1770_v33 = vadd.f32 %v4101_v28, %v1657_v32 }
 0xa8a   : > { %v2007_v27 = vpop.permute.xlu0 %2006 }
 0xa8b   : > { %1774 = vst.msk [vmem:[#allocation5 + $0x58] sm:$0xff] %vm701_vm4, %v1770_v33  ;;  %v2020_v42 = vmul.f32 %v2007_v27, %v1996_v61 }
 0xa8e   : > { %v2002_v51 = vpop.permute.xlu0 %2001 }
 0xa8f   : > { %v2019_v58 = vmul.f32 %v2002_v51, %v1995_v26 }
 0xa92   : > { %v2017_v19 = vpop.permute.xlu0 %2016 }
 0xa93   : > { %v2022_v35 = vmul.f32 %v2017_v19, %v1998_v41 }
 0xaba   : > { %v1979_v50 = vpop.xlane.xlu1 %1978 }
 0xabb   : > { %v1987_v38 = vadd.f32 %v1979_v50, %v1971_v53 }
 0xabd   : > { %1991 = vst.msk [vmem:[#allocation4 + $0x68] sm:$0xff] %vm903_vm10, %v1987_v38 }
 0xabe   : > { %v1976_v2 = vpop.xlane.xlu1 %1975 }
 0xabf   : > { %v1986_v4 = vadd.f32 %v1976_v2, %v1970_v40 }
 0xac1   : > { %1990 = vst.msk [vmem:[#allocation4 + $0x60] sm:$0xff] %vm903_vm10, %v1986_v4 }
 0xac2   : > { %v1985_v28 = vpop.xlane.xlu1 %1984 }
 0xac3   : > { %v1989_v17 = vadd.f32 %v1985_v28, %v1973_v5 }
 0xac5   : > { %1993 = vst.msk [vmem:[#allocation4 + $0x78] sm:$0xff] %vm903_vm10, %v1989_v17 }
 0xac6   : > { %v1982_v21 = vpop.xlane.xlu1 %1981 }
 0xac7   : > { %v1988_v23 = vadd.f32 %v1982_v21, %v1972_v15 }
 0xac9   : > { %1992 = vst.msk [vmem:[#allocation4 + $0x70] sm:$0xff] %vm903_vm10, %v1988_v23 }
 0xaca   : > { %v2012_v34 = vpop.permute.xlu1 %2011 }
 0xacb   : > { %v2021_v3 = vmul.f32 %v2012_v34, %v1997_v56 }
 0xb05   : > { %v2892_v9 = vpop.f32.mrb[16].mxu0 }
 0xb06   : > { %v2133_v44 = vadd.f32 %v2892_v9, %v2020_v42  ;;  %v2113_v39 = vpop.f32.mrb[17].mxu0 }
 0xb07   : > { %v2132_v46 = vadd.f32 %v2113_v39, %v2019_v58 }
 0xb08   : > { %2137 = vst.msk [vmem:[#allocation5 + $0x68] sm:$0xff] %vm701_vm4, %v2133_v44 }
 0xb09   : > { %2136 = vst.msk [vmem:[#allocation5 + $0x60] sm:$0xff] %vm701_vm4, %v2132_v46  ;;  %v2895_v18 = vpop.f32.mrb[18].mxu0 }
 0xb0a   : > { %v2135_v30 = vadd.f32 %v2895_v18, %v2022_v35  ;;  %v2123_v7 = vpop.f32.mrb[19].mxu0 }
 0xb0b   : > { %v2134_v22 = vadd.f32 %v2123_v7, %v2021_v3 }
 0xb0c   : > { %2139 = vst.msk [vmem:[#allocation5 + $0x78] sm:$0xff] %vm701_vm4, %v2135_v30 }
 0xb0d   : > { %2138 = vst.msk [vmem:[#allocation5 + $0x70] sm:$0xff] %vm701_vm4, %v2134_v22 }
 0xb0e PF: > { %p2611_p4 = scmp.ne.s32.totalorder %s3377_s21, 3 }
 0xb0f   : > { %v2199_v25 = vld [vmem:[#allocation4 + $0x30] sm:$0xff] (!%p2611_p4)  ;;  %v2197_v12 = vld [vmem:[#allocation4 + $0x20] sm:$0xff] (!%p2611_p4)  ;;  %v2200_v60 = vld [vmem:[#allocation4 + $0x38] sm:$0xff] (!%p2611_p4)  ;;  %v3409_v57 = vmov (!%p2611_p4), 0   ;;  %s3410_s21 = smov (!%p2611_p4), 32   ;;  %s3411_s10 = smov (!%p2611_p4), 64  }
 0xb10   : > { %2147 = sbr.rel (%p2611_p4) target bundleno = 3121 (0xc31), region = 52  ;;  %3258 = vset.pattern.permute.xlu1 (!%p2611_p4), %v3409_v57  ;;  %3257 = vset.pattern.permute.xlu0 (!%p2611_p4), %v3409_v57  ;;  %3259 = vrcp.f32 (!%p2611_p4), %v2199_v25  ;;  %v2198_v55 = vld [vmem:[#allocation4 + $0x28] sm:$0xff] (!%p2611_p4)  ;;  %v2247_v24 = vld [vmem:[#allocation4 + $0x40] sm:$0xff] (!%p2611_p4)  ;;  %v2250_v62 = vld [vmem:[#allocation4 + $0x58] sm:$0xff] (!%p2611_p4)  ;;  %s3412_s11 = smov (!%p2611_p4), 96   ;;  %vm2394_vm11 = vcmask (!%p2611_p4), 261120  }
 0xb11   : > { %3261 = vrcp.f32 (!%p2611_p4), %v2197_v12  ;;  %v2248_v36 = vld [vmem:[#allocation4 + $0x48] sm:$0xff] (!%p2611_p4)  ;;  %v2249_v6 = vld [vmem:[#allocation4 + $0x50] sm:$0xff] (!%p2611_p4)  ;;  %v2297_v14 = vld [vmem:[#allocation4 + $0x60] sm:$0xff] (!%p2611_p4)  ;;  %vm2399_vm12 = vcmask (!%p2611_p4), 523264   ;;  %vm2404_vm13 = vcmask (!%p2611_p4), 785408  }
 0xb12   : > { %3263 = vrcp.f32 (!%p2611_p4), %v2200_v60  ;;  %v2298_v0 = vld [vmem:[#allocation4 + $0x68] sm:$0xff] (!%p2611_p4)  ;;  %v2300_v20 = vld [vmem:[#allocation4 + $0x78] sm:$0xff] (!%p2611_p4)  ;;  %v2299_v16 = vld [vmem:[#allocation4 + $0x70] sm:$0xff] (!%p2611_p4) }
 0xb13   : > { %3265 = vrcp.f32 (!%p2611_p4), %v2198_v55  ;;  %v2149_v63 = vld [vmem:[#allocation4 + $0x8] sm:$0xff] (!%p2611_p4)  ;;  %v2148_v13 = vld [vmem:[#allocation4] sm:$0xff] (!%p2611_p4)  ;;  %v2151_v28 = vld [vmem:[#allocation4 + $0x18] sm:$0xff] (!%p2611_p4) }
 0xb14   : > { %3267 = vrcp.f32 (!%p2611_p4), %v2248_v36  ;;  %v2150_v23 = vld [vmem:[#allocation4 + $0x10] sm:$0xff] (!%p2611_p4) }
 0xb15   : > { %3269 = vrcp.f32 (!%p2611_p4), %v2247_v24 }
 0xb16   : > { %3271 = vrcp.f32 (!%p2611_p4), %v2250_v62 }
 0xb17   : > { %3273 = vrcp.f32 %v2249_v6 }
 0xb18   : > { %3275 = vrcp.f32 %v2298_v0 }
 0xb19   : > { %3277 = vrcp.f32 %v2297_v14 }
 0xb1a   : > { %v3260_v52 = vpop.eup %3259  ;;  %3279 = vrcp.f32 %v2300_v20 }
 0xb1b   : > { %v3262_v49 = vpop.eup %3261  ;;  %v2207_v45 = vmul.f32 %v3260_v52, %v2199_v25  ;;  %3281 = vrcp.f32 %v2299_v16 }
 0xb1c   : > { %v3264_v59 = vpop.eup %3263  ;;  %v2205_v43 = vmul.f32 %v3262_v49, %v2197_v12  ;;  %3283 = vrcp.f32 %v2149_v63 }
 0xb1d   : > { %v3266_v11 = vpop.eup %3265  ;;  %v2211_v47 = vsub.f32 2.0, %v2207_v45  ;;  %v2208_v29 = vmul.f32 %v3264_v59, %v2200_v60  ;;  %3285 = vrcp.f32 %v2148_v13 }
 0xb1e   : > { %v3268_v31 = vpop.eup %3267  ;;  %v2209_v10 = vsub.f32 2.0, %v2205_v43  ;;  %v2206_v1 = vmul.f32 %v3266_v11, %v2198_v55  ;;  %3287 = vrcp.f32 %v2151_v28  ;;  %v2218_v43 = vld [vmem:[#allocation5 + $0x20] sm:$0xff] }
 0xb1f   : > { %v3270_v32 = vpop.eup %3269  ;;  %v2215_v33 = vmul.f32 %v3260_v52, %v2211_v47  ;;  %v2212_v54 = vsub.f32 2.0, %v2208_v29  ;;  %v2256_v53 = vmul.f32 %v3268_v31, %v2248_v36  ;;  %3289 = vrcp.f32 %v2150_v23  ;;  %v2220_v47 = vld [vmem:[#allocation5 + $0x30] sm:$0xff] }
 0xb20   : > { %v3272_v50 = vpop.eup %3271  ;;  %v2213_v37 = vmul.f32 %v3262_v49, %v2209_v10  ;;  %v2210_v38 = vsub.f32 2.0, %v2206_v1  ;;  %v2255_v40 = vmul.f32 %v3270_v32, %v2247_v24 }
 0xb21   : > { %v3274_v2 = vpop.eup %3273  ;;  %2234 = vperm.xlu1 %3258, %v2215_v33   ;;  %v2216_v48 = vmul.f32 %v3264_v59, %v2212_v54  ;;  %v2260_v4 = vsub.f32 2.0, %v2256_v53  ;;  %v2258_v5 = vmul.f32 %v3272_v50, %v2250_v62  ;;  %v2221_v33 = vld [vmem:[#allocation5 + $0x38] sm:$0xff]  ;;  %v2268_v54 = vld [vmem:[#allocation5 + $0x40] sm:$0xff] }
 0xb22   : > { %v3276_v8 = vpop.eup %3275  ;;  %2224 = vperm.xlu0 %3257, %v2213_v37   ;;  %v2214_v17 = vmul.f32 %v3266_v11, %v2210_v38  ;;  %v2259_v15 = vsub.f32 2.0, %v2255_v40  ;;  %v2257_v21 = vmul.f32 %v3274_v2, %v2249_v6  ;;  %v2269_v40 = vld [vmem:[#allocation5 + $0x48] sm:$0xff] }
 0xb23   : > { %v3278_v27 = vpop.eup %3277  ;;  %v2264_v51 = vmul.f32 %v3268_v31, %v2260_v4  ;;  %v2262_v61 = vsub.f32 2.0, %v2258_v5  ;;  %v2306_v26 = vmul.f32 %v3276_v8, %v2298_v0  ;;  %v2219_v31 = vld [vmem:[#allocation5 + $0x28] sm:$0xff] }
 0xb24   : > { %v3280_v42 = vpop.eup %3279  ;;  %v2263_v58 = vmul.f32 %v3270_v32, %v2259_v15  ;;  %v2261_v41 = vsub.f32 2.0, %v2257_v21  ;;  %v2305_v19 = vmul.f32 %v3278_v27, %v2297_v14 }
 0xb25   : > { %2239 = vperm.xlu1 %3258, %v2216_v48   ;;  %v3282_v9 = vpop.eup %3281  ;;  %v2266_v56 = vmul.f32 %v3272_v50, %v2262_v61  ;;  %v2310_v34 = vsub.f32 2.0, %v2306_v26  ;;  %v2308_v44 = vmul.f32 %v3280_v42, %v2300_v20  ;;  %v2320_v61 = vld [vmem:[#allocation5 + $0x70] sm:$0xff] }
 0xb26   : > { %2229 = vperm.xlu0 %3257, %v2214_v17   ;;  %v3284_v39 = vpop.eup %3283  ;;  %v2265_v46 = vmul.f32 %v3274_v2, %v2261_v41  ;;  %v2309_v35 = vsub.f32 2.0, %v2305_v19  ;;  %v2307_v3 = vmul.f32 %v3282_v9, %v2299_v16  ;;  %v2270_v2 = vld [vmem:[#allocation5 + $0x50] sm:$0xff]  ;;  %v2318_v17 = vld [vmem:[#allocation5 + $0x60] sm:$0xff]  ;;  %v2321_v41 = vld [vmem:[#allocation5 + $0x78] sm:$0xff] }
 0xb27   : > { %v3286_v18 = vpop.eup %3285  ;;  %v2314_v30 = vmul.f32 %v3276_v8, %v2310_v34  ;;  %v2312_v7 = vsub.f32 2.0, %v2308_v44  ;;  %v2157_v22 = vmul.f32 %v3284_v39, %v2149_v63  ;;  %v2271_v8 = vld [vmem:[#allocation5 + $0x58] sm:$0xff] }
 0xb28   : > { %v3288_v25 = vpop.eup %3287  ;;  %v2313_v12 = vmul.f32 %v3278_v27, %v2309_v35  ;;  %v2311_v60 = vsub.f32 2.0, %v2307_v3  ;;  %v2156_v57 = vmul.f32 %v3286_v18, %v2148_v13 }
 0xb29   : > { %2279 = vperm.xlu1 %3258, %v2264_v51   ;;  %v3290_v55 = vpop.eup %3289  ;;  %v2316_v36 = vmul.f32 %v3280_v42, %v2312_v7  ;;  %v2161_v24 = vsub.f32 2.0, %v2157_v22  ;;  %v2159_v62 = vmul.f32 %v3288_v25, %v2151_v28  ;;  %v2319_v51 = vld [vmem:[#allocation5 + $0x68] sm:$0xff]  ;;  %v2168_v7 = vld [vmem:[#allocation5] sm:$0xff] }
 0xb2a   : > { %2274 = vperm.xlu0 %3257, %v2263_v58   ;;  %v2315_v6 = vmul.f32 %v3282_v9, %v2311_v60  ;;  %v2160_v0 = vsub.f32 2.0, %v2156_v57  ;;  %v2158_v14 = vmul.f32 %v3290_v55, %v2150_v23  ;;  %v2169_v60 = vld [vmem:[#allocation5 + $0x8] sm:$0xff]  ;;  %v2170_v57 = vld [vmem:[#allocation5 + $0x10] sm:$0xff] }
 0xb2b   : > { %v2165_v20 = vmul.f32 %v3284_v39, %v2161_v24  ;;  %v2163_v52 = vsub.f32 2.0, %v2159_v62 }
 0xb2c   : > { %v2164_v16 = vmul.f32 %v3286_v18, %v2160_v0  ;;  %v2162_v49 = vsub.f32 2.0, %v2158_v14 }
 0xb2d   : > { %2289 = vperm.xlu1 %3258, %v2266_v56   ;;  %v2167_v45 = vmul.f32 %v3288_v25, %v2163_v52 }
 0xb2e   : > { %2284 = vperm.xlu0 %3257, %v2265_v46   ;;  %v2166_v59 = vmul.f32 %v3290_v55, %v2162_v49 }
 0xb31   : > { %2329 = vperm.xlu1 %3258, %v2314_v30  }
 0xb32   : > { %2324 = vperm.xlu0 %3257, %v2313_v12  }
 0xb35   : > { %2339 = vperm.xlu1 %3258, %v2316_v36  }
 0xb36   : > { %2334 = vperm.xlu0 %3257, %v2315_v6  }
 0xb39   : > { %2179 = vperm.xlu1 %3258, %v2165_v20   ;;  %v2171_v20 = vld [vmem:[#allocation5 + $0x18] sm:$0xff] }
 0xb3a   : > { %2174 = vperm.xlu0 %3257, %v2164_v16  }
 0xb3d   : > { %2189 = vperm.xlu1 %3258, %v2167_v45  }
 0xb3e   : > { %2184 = vperm.xlu0 %3257, %v2166_v59  }
 0xba0   : > { %v2235_v11 = vpop.permute.xlu1 %2234 }
 0xba1   : > { %v2225_v29 = vpop.permute.xlu0 %2224  ;;  %v2244_v10 = vmul.f32 %v2235_v11, %v2220_v47 }
 0xba2   : > { %v2242_v63 = vmul.f32 %v2225_v29, %v2218_v43 }
 0xba4   : > { %2350 = vrot.lane.b32.xlu0 %v2242_v63, %s3410_s21  ;;  %v2240_v1 = vpop.permute.xlu1 %2239 }
 0xba5   : > { %v2230_v13 = vpop.permute.xlu0 %2229  ;;  %v2245_v37 = vmul.f32 %v2240_v1, %v2221_v33 }
 0xba6   : > { %v2243_v32 = vmul.f32 %v2230_v13, %v2219_v31 }
 0xba8   : > { %2352 = vrot.lane.b32.xlu1 %v2243_v32, %s3410_s21  ;;  %2354 = vrot.lane.b32.xlu0 %v2244_v10, %s3410_s21  ;;  %v2280_v53 = vpop.permute.xlu1 %2279 }
 0xba9   : > { %v2275_v50 = vpop.permute.xlu0 %2274  ;;  %v2293_v5 = vmul.f32 %v2280_v53, %v2269_v40 }
 0xbaa   : > { %v2292_v38 = vmul.f32 %v2275_v50, %v2268_v54 }
 0xbac   : > { %2356 = vrot.lane.b32.xlu1 %v2245_v37, %s3410_s21  ;;  %2366 = vrot.lane.b32.xlu0 %v2292_v38, %s3411_s10  ;;  %v2290_v48 = vpop.permute.xlu1 %2289 }
 0xbad   : > { %v2285_v4 = vpop.permute.xlu0 %2284  ;;  %v2295_v23 = vmul.f32 %v2290_v48, %v2271_v8 }
 0xbae   : > { %v2294_v28 = vmul.f32 %v2285_v4, %v2270_v2 }
 0xbb0   : > { %2368 = vrot.lane.b32.xlu1 %v2293_v5, %s3411_s10  ;;  %2370 = vrot.lane.b32.xlu0 %v2294_v28, %s3411_s10  ;;  %v2330_v15 = vpop.permute.xlu1 %2329 }
 0xbb1   : > { %v2325_v21 = vpop.permute.xlu0 %2324  ;;  %v2343_v42 = vmul.f32 %v2330_v15, %v2319_v51 }
 0xbb2   : > { %v2342_v27 = vmul.f32 %v2325_v21, %v2318_v17 }
 0xbb4   : > { %2372 = vrot.lane.b32.xlu1 %v2295_v23, %s3411_s10  ;;  %2382 = vrot.lane.b32.xlu0 %v2342_v27, %s3412_s11  ;;  %v2340_v19 = vpop.permute.xlu1 %2339 }
 0xbb5   : > { %v2335_v26 = vpop.permute.xlu0 %2334  ;;  %v2345_v9 = vmul.f32 %v2340_v19, %v2321_v41 }
 0xbb6   : > { %v2344_v58 = vmul.f32 %v2335_v26, %v2320_v61 }
 0xbb8   : > { %2384 = vrot.lane.b32.xlu1 %v2343_v42, %s3412_s11  ;;  %2386 = vrot.lane.b32.xlu0 %v2344_v58, %s3412_s11  ;;  %v2180_v34 = vpop.permute.xlu1 %2179 }
 0xbb9   : > { %v2175_v56 = vpop.permute.xlu0 %2174  ;;  %v2193_v6 = vmul.f32 %v2180_v34, %v2169_v60 }
 0xbba   : > { %v2192_v12 = vmul.f32 %v2175_v56, %v2168_v7 }
 0xbbc   : > { %2388 = vrot.lane.b32.xlu1 %v2345_v9, %s3412_s11  ;;  %v2190_v39 = vpop.permute.xlu1 %2189 }
 0xbbd   : > { %v2185_v44 = vpop.permute.xlu0 %2184  ;;  %v2195_v11 = vmul.f32 %v2190_v39, %v2171_v20 }
 0xbbe   : > { %v2194_v0 = vmul.f32 %v2185_v44, %v2170_v57 }
 0xc16   : > { %v2351_v46 = vpop.permute.xlu0 %2350 }
 0xc17   : > { %v2395_v55 = vsel %vm2394_vm11, %v2192_v12, %v2351_v46 }
 0xc1a   : > { %v2353_v35 = vpop.permute.xlu1 %2352  ;;  %v2355_v3 = vpop.permute.xlu0 %2354 }
 0xc1b   : > { %v2396_v52 = vsel %vm2394_vm11, %v2193_v6, %v2353_v35  ;;  %v2397_v16 = vsel %vm2394_vm11, %v2194_v0, %v2355_v3 }
 0xc1e   : > { %v2357_v18 = vpop.permute.xlu1 %2356  ;;  %v2367_v30 = vpop.permute.xlu0 %2366 }
 0xc1f   : > { %v2400_v36 = vsel %vm2399_vm12, %v2395_v55, %v2367_v30  ;;  %v2398_v63 = vsel %vm2394_vm11, %v2195_v11, %v2357_v18 }
 0xc22   : > { %v2369_v22 = vpop.permute.xlu1 %2368  ;;  %v2371_v25 = vpop.permute.xlu0 %2370 }
 0xc23   : > { %v2401_v49 = vsel %vm2399_vm12, %v2396_v52, %v2369_v22  ;;  %v2402_v45 = vsel %vm2399_vm12, %v2397_v16, %v2371_v25 }
 0xc26   : > { %v2373_v24 = vpop.permute.xlu1 %2372  ;;  %v2383_v62 = vpop.permute.xlu0 %2382 }
 0xc27   : > { %v2405_v14 = vsel %vm2404_vm13, %v2400_v36, %v2383_v62  ;;  %v2403_v31 = vsel %vm2399_vm12, %v2398_v63, %v2373_v24 }
 0xc28   : > { %2409 = vst [vmem:[%s3554_s28] sm:$0xff] %v2405_v14 }
 0xc2a   : > { %v2385_v59 = vpop.permute.xlu1 %2384  ;;  %v2387_v43 = vpop.permute.xlu0 %2386 }
 0xc2b   : > { %v2406_v47 = vsel %vm2404_vm13, %v2401_v49, %v2385_v59  ;;  %v2407_v29 = vsel %vm2404_vm13, %v2402_v45, %v2387_v43 }
 0xc2c   : > { %2410 = vst [vmem:[%s3554_s28 + $0x8] sm:$0xff] %v2406_v47  ;;  %2411 = vst [vmem:[%s3554_s28 + $0x10] sm:$0xff] %v2407_v29 }
 0xc2e   : > { %v2389_v10 = vpop.permute.xlu1 %2388 }
 0xc2f   : > { %v2408_v1 = vsel %vm2404_vm13, %v2403_v31, %v2389_v10 }
 0xc30   : > { %2412 = vst [vmem:[%s3554_s28 + $0x18] sm:$0xff] %v2408_v1 }
 0xc31 PF: > { %s2614_s12 = sshll.u32 %s3385_s23, 4  ;;  %s2429_s29 = sshll.u32 %s3554_s28, 4  ;;  %s4389_s29 = int_to_ptr.vmem [resolvable:$true] %s2429_s29 }
 0xc32   : > { %s2426_s13 = sadd.s32 %s2614_s12, %s3533_s16  ;;  %s4506_s6 = sand.u32 1, %s3369_s19  }
 0xc33   : > { %s2615_s30 = sshll.u32 %s2426_s13, 7  ;;  %s4398_s14 = scalar_lea.sflag [#allocation7], %s4506_s6 }
 0xc34   : > { %s4394_s26 = scalar_lea.hbm %s4461_s5, %s2615_s30  ;;  %s3291_s15 = scalar_lea.vmem %s4389_s29, 512 }
 0xc35   : > { %p3292_p5 = scmp.ne.s32.totalorder %s4389_s29, %s3291_s15  ;;  %s3413_s23 = smov [#allocation6]  }
 0xc36   : > { %s3295_s16 = sshll.u32 %s3413_s23, 4  ;;  %s3296_s16 = int_to_ptr.vmem [resolvable:$false] %s3295_s16 }
 0xc37   : > { %p3293_p8 = pnand %p3292_p5, %p3508_p6  ;;  %s3297_s28 = scalar_lea.vmem %s3296_s16, 1024 }
 0xc38   : > { %p3298_p10 = scmp.lt.s32.totalorder %s4389_s29, %s3296_s16  ;;  %p3299_p11 = scmp.lt.s32.totalorder %s3297_s28, %s3291_s15 }
 0xc39   : > { %p3294_p9 = pneg %p3293_p8 }
 0xc3a   : > { %p3300_p12 = por %p3299_p11, %p3298_p10 }
 0xc3c   : > { %p3301_p13 = pnand %p3300_p12, %p3294_p9 }
 0xc3e   : > { %3304 = shalt.err (!%p3301_p13)
}
 0xc3f   : > { %s3305_s9 = scalar_lea.hbm %s4394_s26, 512  ;;  %s3309_s25 = scalar_lea.hbm %s4461_s5, 4096 }
 0xc40   : > { %p3306_p0 = scmp.ne.s32.totalorder %s4394_s26, %s3305_s9  ;;  %p3310_p3 = scmp.lt.u32.totalorder %s4394_s26, %s4461_s5 }
 0xc41   : > { %p3311_p4 = scmp.lt.u32.totalorder %s3309_s25, %s3305_s9  ;;  %p3313_p8 = scmp.lt.u32.totalorder %s3305_s9, %s4394_s26 }
 0xc42   : > { %p3307_p1 = pnand %p3306_p0, %p3508_p6 }
 0xc43   : > { %p3312_p5 = por %p3311_p4, %p3310_p3 }
 0xc44   : > { %p3308_p2 = pneg %p3307_p1 }
 0xc45   : > { %p3314_p9 = por %p3313_p8, %p3312_p5 }
 0xc47   : > { %p3315_p10 = pnand %p3314_p9, %p3308_p2 }
 0xc49   : > { %3318 = shalt.err (!%p3315_p10)
}
 0xc4a   : > { %s3414_s10 = smov 128   ;;  %s3415_s11 = smov 8  }
 0xc4b   : > { %3032 = dma.vmem_to_hbm [thread:$0]  (%p3508_p6), %s4389_s29, 512, %s4394_s26, %s4398_s14, %s3414_s10, %s3414_s10, %s3415_s11  }
 0xc4c PF: > { %p3038_p11 = scmp.ge.s32.totalorder %s3401_s27, 2  ;;  %s2444_s13 = sand.u32 1, %s3365_s18  }
 0xc4d   : > { %s2445_s30 = scalar_lea.sflag [#allocation7], %s2444_s13 }
 0xc4e   : > { %p3035_p12 = pnand %p3038_p11, %p3515_p7 }
 0xc50   : > { %3360 = dma.done.wait (!%p3035_p12), %s2445_s30, 512  }
 0xc51   : > { %3362 = vsyncadd (!%p3035_p12), %s2445_s30, 4294966784  ;;  %s18_s27 = sadd.s32 1, %s3401_s27   ;;  %s4508_s20 = sld [smem:[#allocation9_spill]] }
 0xc52   : > { %p15_p13 = scmp.ge.s32.totalorder %s18_s27, 34   ;;  %s4509_s24 = sld [smem:[#allocation17_spill]] }
 0xc53   : > { %s4510_s21 = sld [smem:[#allocation10_spill]]  ;;  %s4511_s22 = sld [smem:[#allocation11_spill]] }
 0xc54   : > { %s4512_s23 = sld [smem:[#allocation12_spill]]  ;;  %s4513_s8 = sld [smem:[#allocation13_spill]] }
 0xc55   : > { %s4514_s25 = sld [smem:[#allocation14_spill]]  ;;  %s4515_s26 = sld [smem:[#allocation16_spill]] }
 0xc56   : > { %s4516_s18 = smov %s3369_s19  ;;  %17 = sbr.rel (!%p15_p13) target bundleno = 6 (0x6), region = 105 }
 0xc57   : > { %s4517_s19 = smov %s4508_s20 }
 0xc58   : > { %s4518_s20 = smov %s4509_s24 }
 0xc5a   : > { %s4519_s24 = smov %s4513_s8 }
 0xc5d   :  { %2450 = vsyncpa [#allocation7], 1 }
 0xc5e   :  { %2452 = vsyncpa [#allocation7 + $0x1], 1 }

</bundles_post_ra>
